<compile_context>
chip_gen: v6e
topology: v6e:2x2x1
jax: 0.10.0
libtpu: 0.0.40
codegen_flags: <defaults>
</compile_context>

<pallas_src>
import functools
import math

import jax
import jax.numpy as jnp
import numpy as np
from jax.experimental import pallas as pl
from jax.experimental.pallas import tpu as pltpu

# "highest" only affects f32 matmuls (reference + f32 verification path); the
# bf16 fast path feeds bf16 operands to the MXU and is unaffected.
jax.config.update("jax_default_matmul_precision", "highest")


# ----------------------------- Pallas kernels ------------------------------

def _convt_block_kernel(p_ref, w_ref, b_ref, g1_ref, bt1_ref, g2_ref, bt2_ref,
                        o_ref, *, second_norm, eps):
    """Per-batch: conv-as-matmul + bias + GroupNorm(C groups) + SiLU
    (+ optional second GroupNorm, used to fuse clip_norm into the last block).

    p_ref: (1, Cin*9, HW)   w_ref: (Cout, Cin*9)   b/g/bt refs: (Cout, 1)
    o_ref: (1, Cout, HW)
    """
    y = jnp.dot(w_ref[...], p_ref[0], preferred_element_type=jnp.float32)
    y = y + b_ref[...]                                   # (Cout, HW), f32

    mean = jnp.mean(y, axis=-1, keepdims=True)
    var = jnp.mean((y - mean) ** 2, axis=-1, keepdims=True)
    y = (y - mean) * jax.lax.rsqrt(var + eps)
    y = y * g1_ref[...] + bt1_ref[...]
    y = y * jax.nn.sigmoid(y)                            # SiLU

    if second_norm:                                      # fused clip_norm
        mean = jnp.mean(y, axis=-1, keepdims=True)
        var = jnp.mean((y - mean) ** 2, axis=-1, keepdims=True)
        y = (y - mean) * jax.lax.rsqrt(var + eps)
        y = y * g2_ref[...] + bt2_ref[...]

    o_ref[0] = y


def _qkv_conv_kernel(pq_ref, pkv_ref, wq_ref, wkv_ref, q_ref, kv_ref):
    """Per-batch dual bias-free conv: query conv and key/value conv."""
    q_ref[0] = jnp.dot(wq_ref[...], pq_ref[0], preferred_element_type=jnp.float32)
    kv_ref[0] = jnp.dot(wkv_ref[...], pkv_ref[0], preferred_element_type=jnp.float32)


def _attn_res_norm_kernel(x_ref, q_ref, k_ref, v_ref, g_ref, b_ref, s_ref, o_ref,
                          *, scale, eps, mxu_dtype):
    """Per-batch: all-heads scaled-dot-product attention + residual +
    GroupNorm(C groups) + clip_scale multiply.

    x/q/k/v refs: (1, nheads, hl, HW)   g/b refs: (nheads, hl, 1)
    s_ref: (1, 1, 1) clip_scale         o_ref: (1, nheads, hl, HW)
    """
    q = (q_ref[0] * scale).astype(mxu_dtype)             # fold 1/sqrt(E) into q
    k = k_ref[0].astype(mxu_dtype)
    v = v_ref[0].astype(mxu_dtype)

    s = jnp.einsum("hld,hmd->hlm", q, k,
                   preferred_element_type=jnp.float32)   # (nh, hl, hl)
    s = s - jnp.max(s, axis=-1, keepdims=True)
    p = jnp.exp(s)
    p = p / jnp.sum(p, axis=-1, keepdims=True)
    attn = jnp.einsum("hlm,hmd->hld", p.astype(mxu_dtype), v,
                      preferred_element_type=jnp.float32)  # (nh, hl, HW)

    y = x_ref[0] + attn                                  # residual, f32
    mean = jnp.mean(y, axis=-1, keepdims=True)
    var = jnp.mean((y - mean) ** 2, axis=-1, keepdims=True)
    y = (y - mean) * jax.lax.rsqrt(var + eps)
    y = y * g_ref[...] + b_ref[...]
    o_ref[0] = y * s_ref[...]                            # clip_scale broadcast


# --------------------- JAX glue: patches (im2col) ---------------------------
# TODO(synk): patch extraction / zero-dilation is plain JAX (XLA); at these
# sizes it is negligible, a fully in-kernel 9-tap accumulation would remove it.

def _im2col(xp, k=3):
    """xp: padded (B, C, Hp, Wp) -> (B, C*k*k, Ho*Wo), K order = (ci, ky, kx)."""
    B, C, Hp, Wp = xp.shape
    Ho, Wo = Hp - k + 1, Wp - k + 1
    cols = [xp[:, :, ky:ky + Ho, kx:kx + Wo] for ky in range(k) for kx in range(k)]
    p = jnp.stack(cols, axis=2)                          # (B, C, 9, Ho, Wo)
    return p.reshape(B, C * k * k, Ho * Wo), Ho, Wo


def _conv3x3_patches(x):
    """Conv2d k=3, s=1, p=1 patches."""
    xp = jnp.pad(x, ((0, 0), (0, 0), (1, 1), (1, 1)))
    return _im2col(xp)


def _convT3x3_s2_patches(x):
    """ConvTranspose2d k=3, s=2, p=1, op=1 as dilate + pad + ordinary conv."""
    B, Cin, H, W = x.shape
    xd = jnp.zeros((B, Cin, 2 * H - 1, 2 * W - 1), x.dtype)
    xd = xd.at[:, :, ::2, ::2].set(x)
    xp = jnp.pad(xd, ((0, 0), (0, 0), (1, 2), (1, 2)))
    return _im2col(xp)


# --------------------------- kernel wrappers ---------------------------------

_PAR = pltpu.CompilerParams(dimension_semantics=("parallel",))


def clip2conv_block(x, w, bias, g1, bt1, g2=None, bt2=None, *,
                    mxu_dtype=jnp.bfloat16, eps=1e-5):
    """ConvTranspose2d(k3,s2,p1,op1) + GroupNorm + SiLU (+ optional 2nd GN)."""
    B, Cin, H, W = x.shape
    Cout = w.shape[1]
    patches, Ho, Wo = _convT3x3_s2_patches(x)
    hw = Ho * Wo
    wf = jnp.flip(w, axis=(2, 3)).transpose(1, 0, 2, 3).reshape(Cout, Cin * 9)
    second = g2 is not None
    if not second:
        g2, bt2 = g1, bt1                                 # unused dummies

    col = lambda v: v.reshape(Cout, 1).astype(jnp.float32)
    out = pl.pallas_call(
        functools.partial(_convt_block_kernel, second_norm=second, eps=eps),
        out_shape=jax.ShapeDtypeStruct((B, Cout, hw), jnp.float32),
        grid=(B,),
        in_specs=[
            pl.BlockSpec((1, Cin * 9, hw), lambda i: (i, 0, 0)),
            pl.BlockSpec((Cout, Cin * 9), lambda i: (0, 0)),
            pl.BlockSpec((Cout, 1), lambda i: (0, 0)),
            pl.BlockSpec((Cout, 1), lambda i: (0, 0)),
            pl.BlockSpec((Cout, 1), lambda i: (0, 0)),
            pl.BlockSpec((Cout, 1), lambda i: (0, 0)),
            pl.BlockSpec((Cout, 1), lambda i: (0, 0)),
        ],
        out_specs=pl.BlockSpec((1, Cout, hw), lambda i: (i, 0, 0)),
        compiler_params=_PAR,
    )(patches.astype(mxu_dtype), wf.astype(mxu_dtype),
      col(bias), col(g1), col(bt1), col(g2), col(bt2))
    return out.reshape(B, Cout, Ho, Wo)


def qkv_convs(inputs, clip_out, wq, wkv, *, mxu_dtype=jnp.bfloat16):
    """Bias-free attn_q and attn_kv 3x3 convs in a single dual-output kernel."""
    B, C, H, W = inputs.shape
    hw = H * W
    pq, _, _ = _conv3x3_patches(inputs)
    pkv, _, _ = _conv3x3_patches(clip_out)
    wq_m = wq.reshape(C, C * 9)
    wkv_m = wkv.reshape(2 * C, C * 9)
    q, kv = pl.pallas_call(
        _qkv_conv_kernel,
        out_shape=(jax.ShapeDtypeStruct((B, C, hw), jnp.float32),
                   jax.ShapeDtypeStruct((B, 2 * C, hw), jnp.float32)),
        grid=(B,),
        in_specs=[
            pl.BlockSpec((1, C * 9, hw), lambda i: (i, 0, 0)),
            pl.BlockSpec((1, C * 9, hw), lambda i: (i, 0, 0)),
            pl.BlockSpec((C, C * 9), lambda i: (0, 0)),
            pl.BlockSpec((2 * C, C * 9), lambda i: (0, 0)),
        ],
        out_specs=(pl.BlockSpec((1, C, hw), lambda i: (i, 0, 0)),
                   pl.BlockSpec((1, 2 * C, hw), lambda i: (i, 0, 0))),
        compiler_params=_PAR,
    )(pq.astype(mxu_dtype), pkv.astype(mxu_dtype),
      wq_m.astype(mxu_dtype), wkv_m.astype(mxu_dtype))
    return q, kv


def attn_res_norm(inputs, q, kv, gamma, beta, clip_scale, *, nheads,
                  mxu_dtype=jnp.bfloat16, eps=1e-5):
    """softmax(qk^T/sqrt(HW)) v  ->  + inputs  ->  GroupNorm  ->  * clip_scale."""
    B, C, H, W = inputs.shape
    hw = H * W
    hl = C // nheads
    scale = 1.0 / math.sqrt(hw)     # F.scaled_dot_product_attention: 1/sqrt(E)

    def heads(t):                   # (B, C, HW) -> (B, nheads, hl, HW), free
        return t.reshape(B, nheads, hl, hw)

    x4 = heads(inputs.reshape(B, C, hw).astype(jnp.float32))
    q4 = heads(q)
    k4 = heads(kv[:, :C])
    v4 = heads(kv[:, C:])

    blk = pl.BlockSpec((1, nheads, hl, hw), lambda i: (i, 0, 0, 0))
    out = pl.pallas_call(
        functools.partial(_attn_res_norm_kernel, scale=scale, eps=eps,
                          mxu_dtype=mxu_dtype),
        out_shape=jax.ShapeDtypeStruct((B, nheads, hl, hw), jnp.float32),
        grid=(B,),
        in_specs=[blk, blk, blk, blk,
                  pl.BlockSpec((nheads, hl, 1), lambda i: (0, 0, 0)),
                  pl.BlockSpec((nheads, hl, 1), lambda i: (0, 0, 0)),
                  pl.BlockSpec((1, 1, 1), lambda i: (i, 0, 0))],
        out_specs=blk,
        compiler_params=_PAR,
    )(x4, q4, k4, v4,
      gamma.reshape(nheads, hl, 1).astype(jnp.float32),
      beta.reshape(nheads, hl, 1).astype(jnp.float32),
      clip_scale.reshape(B, 1, 1).astype(jnp.float32))
    return out.reshape(B, C, H, W)


# ------------------------------ forward pass --------------------------------

def cross_attention_conv_forward(params, inputs, clip_embed, clip_scale, cfg, *,
                                 mxu_dtype=jnp.bfloat16):
    B = inputs.shape[0]
    nheads = cfg["nheads"]

    # clip2conv: Unflatten + (ConvTranspose2d -> GroupNorm -> SiLU) blocks,
    # with the trailing clip_norm fused into the last block's kernel.
    x = clip_embed.reshape(B, cfg["clip_emblen"] // 16, 4, 4)
    n_blocks = len(params["clip2conv"])   # >= 1 for this module configuration
    for li, (w, b, g, bt) in enumerate(params["clip2conv"]):
        last = li == n_blocks - 1
        x = clip2conv_block(
            x, w, b, g, bt,
            g2=params["clip_norm_g"] if last else None,
            bt2=params["clip_norm_b"] if last else None,
            mxu_dtype=mxu_dtype)

    q, kv = qkv_convs(inputs, x, params["attn_q_w"], params["attn_kv_w"],
                      mxu_dtype=mxu_dtype)

    return attn_res_norm(inputs, q, kv, params["attn_norm_g"],
                         params["attn_norm_b"], clip_scale,
                         nheads=nheads, mxu_dtype=mxu_dtype)


# --------------------------- pure-JAX reference ------------------------------

def ref_forward(params, inputs, clip_embed, clip_scale, cfg):
    B, C, H, W = inputs.shape
    chan, nheads = cfg["chan"], cfg["nheads"]
    dn = ("NCHW", "OIHW", "NCHW")

    def gn(x, g, b, eps=1e-5):
        mean = x.mean(axis=(2, 3), keepdims=True)
        var = ((x - mean) ** 2).mean(axis=(2, 3), keepdims=True)
        y = (x - mean) / jnp.sqrt(var + eps)
        return y * g.reshape(1, -1, 1, 1) + b.reshape(1, -1, 1, 1)

    x = clip_embed.reshape(B, cfg["clip_emblen"] // 16, 4, 4)
    for (w, b, g, bt) in params["clip2conv"]:
        wf = jnp.flip(w, axis=(2, 3)).transpose(1, 0, 2, 3)
        x = jax.lax.conv_general_dilated(
            x, wf, (1, 1), ((1, 2), (1, 2)), lhs_dilation=(2, 2),
            dimension_numbers=dn) + b.reshape(1, -1, 1, 1)
        x = gn(x, g, bt)
        x = x * jax.nn.sigmoid(x)
    x = gn(x, params["clip_norm_g"], params["clip_norm_b"])

    kv = jax.lax.conv_general_dilated(x, params["attn_kv_w"], (1, 1),
                                      ((1, 1), (1, 1)), dimension_numbers=dn)
    key, value = kv[:, :chan], kv[:, chan:]
    query = jax.lax.conv_general_dilated(inputs, params["attn_q_w"], (1, 1),
                                         ((1, 1), (1, 1)), dimension_numbers=dn)

    hl = chan // nheads
    q = query.reshape(B, nheads, hl, H * W)
    k = key.reshape(B, nheads, hl, H * W)
    v = value.reshape(B, nheads, hl, H * W)
    s = jnp.einsum("bnld,bnmd->bnlm", q, k) / math.sqrt(H * W)
    p = jax.nn.softmax(s, axis=-1)
    o = jnp.einsum("bnlm,bnmd->bnld", p, v).reshape(B, C, H, W)
    o = inputs + o
    o = gn(o, params["attn_norm_g"], params["attn_norm_b"])
    return o * clip_scale.reshape(B, 1, 1, 1)


# ------------------------------- parameters ----------------------------------

def init_params(key, cfg):
    clip_emblen, chan, size = cfg["clip_emblen"], cfg["chan"], cfg["size"]
    params = {"clip2conv": []}
    in_chan, in_size = clip_emblen // 16, 4
    while in_chan > chan or in_size < size:
        out_size = min(in_size * 2, size)
        out_chan = max(in_chan // 4, chan)
        key, k1, k2, k3, k4 = jax.random.split(key, 5)
        w = jax.random.normal(k1, (in_chan, out_chan, 3, 3), jnp.float32) * 0.2
        b = jax.random.normal(k2, (out_chan,), jnp.float32) * 0.1
        g = 1.0 + 0.1 * jax.random.normal(k3, (out_chan,), jnp.float32)
        bt = 0.1 * jax.random.normal(k4, (out_chan,), jnp.float32)
        params["clip2conv"].append((w, b, g, bt))
        in_chan, in_size = out_chan, out_size
    key, k1, k2, k3, k4, k5, k6 = jax.random.split(key, 7)
    params["clip_norm_g"] = 1.0 + 0.1 * jax.random.normal(k1, (chan,), jnp.float32)
    params["clip_norm_b"] = 0.1 * jax.random.normal(k2, (chan,), jnp.float32)
    params["attn_kv_w"] = jax.random.normal(k3, (2 * chan, chan, 3, 3), jnp.float32) * 0.2
    params["attn_q_w"] = jax.random.normal(k4, (chan, chan, 3, 3), jnp.float32) * 0.2
    params["attn_norm_g"] = 1.0 + 0.1 * jax.random.normal(k5, (chan,), jnp.float32)
    params["attn_norm_b"] = 0.1 * jax.random.normal(k6, (chan,), jnp.float32)
    return params


if __name__ == "__main__":
    cfg = dict(clip_emblen=64, chan=4, size=16, nheads=2)
    B = 2

    key = jax.random.PRNGKey(0)
    key, k1, k2, k3, kp = jax.random.split(key, 5)
    inputs = jax.random.normal(k1, (B, cfg["chan"], cfg["size"], cfg["size"]), jnp.float32)
    clip_embed = jax.random.normal(k2, (B, cfg["clip_emblen"]), jnp.float32)
    clip_scale = jax.random.normal(k3, (B, 1, 1, 1), jnp.float32)
    params = init_params(kp, cfg)

    def make_fwd(mxu_dtype):
        def f(params, inputs, clip_embed, clip_scale):
            return cross_attention_conv_forward(params, inputs, clip_embed,
                                                clip_scale, cfg,
                                                mxu_dtype=mxu_dtype)
        return jax.jit(f)

    ref = jax.block_until_ready(ref_forward(params, inputs, clip_embed, clip_scale, cfg))

    # Tight structural check: f32 MXU path vs highest-precision JAX reference.
    out_f32 = jax.block_until_ready(
        make_fwd(jnp.float32)(params, inputs, clip_embed, clip_scale))
    np.testing.assert_allclose(np.asarray(out_f32), np.asarray(ref),
                               rtol=2e-3, atol=2e-3)

    # Fast path: bf16 MXU inputs (f32 accumulation); looser tolerance.
    out_bf16 = jax.block_until_ready(
        make_fwd(jnp.bfloat16)(params, inputs, clip_embed, clip_scale))
    np.testing.assert_allclose(np.asarray(out_bf16), np.asarray(ref),
                               rtol=6e-2, atol=6e-2)

    print("KERNEL_OK")
</pallas_src>

<mosaic_0001>
module attributes {stable_mosaic.version = 11 : i64} {
  func.func @_convt_block_kernel(%arg0: i32, %arg1: memref<1x36x64xf32, #tpu.memory_space<vmem>>, %arg2: memref<4x36xf32, #tpu.memory_space<vmem>>, %arg3: memref<4x1xf32, #tpu.memory_space<vmem>>, %arg4: memref<4x1xf32, #tpu.memory_space<vmem>>, %arg5: memref<4x1xf32, #tpu.memory_space<vmem>>, %arg6: memref<4x1xf32, #tpu.memory_space<vmem>>, %arg7: memref<4x1xf32, #tpu.memory_space<vmem>>, %arg8: memref<1x4x64xf32, #tpu.memory_space<vmem>>) attributes {dimension_semantics = [#tpu.dimension_semantics<parallel>], iteration_bounds = array<i64: 2>, scalar_prefetch = 0 : i64, scratch_operands = 0 : i64, tpu.core_type = #tpu.core_type<tc>, window_params = [{transform_indices = @transform_0, window_bounds = array<i64: 1, 36, 64>}, {pipeline_mode = #tpu.pipeline_mode<synchronous>, transform_indices = @transform_1, window_bounds = array<i64: 4, 36>}, {pipeline_mode = #tpu.pipeline_mode<synchronous>, transform_indices = @transform_2, window_bounds = array<i64: 4, 1>}, {pipeline_mode = #tpu.pipeline_mode<synchronous>, transform_indices = @transform_3, window_bounds = array<i64: 4, 1>}, {pipeline_mode = #tpu.pipeline_mode<synchronous>, transform_indices = @transform_4, window_bounds = array<i64: 4, 1>}, {pipeline_mode = #tpu.pipeline_mode<synchronous>, transform_indices = @transform_5, window_bounds = array<i64: 4, 1>}, {pipeline_mode = #tpu.pipeline_mode<synchronous>, transform_indices = @transform_6, window_bounds = array<i64: 4, 1>}, {transform_indices = @transform_7, window_bounds = array<i64: 1, 4, 64>}]} {
    %c0 = arith.constant 0 : index
    %c0_0 = arith.constant 0 : index
    %0 = vector.load %arg2[%c0, %c0_0] : memref<4x36xf32, #tpu.memory_space<vmem>>, vector<4x36xf32>
    %c0_1 = arith.constant 0 : index
    %c0_2 = arith.constant 0 : index
    %c0_3 = arith.constant 0 : index
    %1 = vector.load %arg1[%c0_1, %c0_2, %c0_3] : memref<1x36x64xf32, #tpu.memory_space<vmem>>, vector<1x36x64xf32>
    %2 = vector.shape_cast %1 : vector<1x36x64xf32> to vector<36x64xf32>
    %cst = arith.constant dense<0.000000e+00> : vector<4x64xf32>
    %3 = tpu.matmul %0, %2, %cst {dimension_numbers = #tpu.dot_dimension_numbers<[1], [0], [0], [1], [0, 0, 1, 1], [], []>, precision = #tpu.contract_precision<fp32>} : vector<4x36xf32>, vector<36x64xf32>, vector<4x64xf32> -> vector<4x64xf32>
    %c0_4 = arith.constant 0 : index
    %c0_5 = arith.constant 0 : index
    %4 = vector.load %arg3[%c0_4, %c0_5] : memref<4x1xf32, #tpu.memory_space<vmem>>, vector<4x1xf32>
    %5 = vector.broadcast %4 : vector<4x1xf32> to vector<4x64xf32>
    %6 = arith.addf %3, %5 : vector<4x64xf32>
    %cst_6 = arith.constant dense<0.000000e+00> : vector<4xf32>
    %7 = vector.multi_reduction <add>, %6, %cst_6 [1] : vector<4x64xf32> to vector<4xf32>
    %8 = vector.shape_cast %7 : vector<4xf32> to vector<4x1xf32>
    %cst_7 = arith.constant 6.400000e+01 : f32
    %9 = vector.broadcast %cst_7 : f32 to vector<4x1xf32>
    %10 = arith.divf %8, %9 : vector<4x1xf32>
    %11 = vector.broadcast %10 : vector<4x1xf32> to vector<4x64xf32>
    %12 = arith.subf %6, %11 : vector<4x64xf32>
    %13 = arith.mulf %12, %12 : vector<4x64xf32>
    %cst_8 = arith.constant dense<0.000000e+00> : vector<4xf32>
    %14 = vector.multi_reduction <add>, %13, %cst_8 [1] : vector<4x64xf32> to vector<4xf32>
    %15 = vector.shape_cast %14 : vector<4xf32> to vector<4x1xf32>
    %cst_9 = arith.constant 6.400000e+01 : f32
    %16 = vector.broadcast %cst_9 : f32 to vector<4x1xf32>
    %17 = arith.divf %15, %16 : vector<4x1xf32>
    %18 = vector.broadcast %10 : vector<4x1xf32> to vector<4x64xf32>
    %19 = arith.subf %6, %18 : vector<4x64xf32>
    %cst_10 = arith.constant 9.99999974E-6 : f32
    %20 = vector.broadcast %cst_10 : f32 to vector<4x1xf32>
    %21 = arith.addf %17, %20 : vector<4x1xf32>
    %22 = math.rsqrt %21 : vector<4x1xf32>
    %23 = vector.broadcast %22 : vector<4x1xf32> to vector<4x64xf32>
    %24 = arith.mulf %19, %23 : vector<4x64xf32>
    %c0_11 = arith.constant 0 : index
    %c0_12 = arith.constant 0 : index
    %25 = vector.load %arg4[%c0_11, %c0_12] : memref<4x1xf32, #tpu.memory_space<vmem>>, vector<4x1xf32>
    %26 = vector.broadcast %25 : vector<4x1xf32> to vector<4x64xf32>
    %27 = arith.mulf %24, %26 : vector<4x64xf32>
    %c0_13 = arith.constant 0 : index
    %c0_14 = arith.constant 0 : index
    %28 = vector.load %arg5[%c0_13, %c0_14] : memref<4x1xf32, #tpu.memory_space<vmem>>, vector<4x1xf32>
    %29 = vector.broadcast %28 : vector<4x1xf32> to vector<4x64xf32>
    %30 = arith.addf %27, %29 : vector<4x64xf32>
    %31 = arith.negf %30 : vector<4x64xf32>
    %32 = math.exp %31 : vector<4x64xf32>
    %cst_15 = arith.constant 1.000000e+00 : f32
    %33 = vector.broadcast %cst_15 : f32 to vector<4x64xf32>
    %34 = arith.addf %33, %32 : vector<4x64xf32>
    %35 = arith.divf %33, %34 : vector<4x64xf32>
    %36 = arith.mulf %30, %35 : vector<4x64xf32>
    %c0_16 = arith.constant 0 : index
    %c0_17 = arith.constant 0 : index
    %c0_18 = arith.constant 0 : index
    %37 = vector.load %arg8[%c0_16, %c0_17, %c0_18] : memref<1x4x64xf32, #tpu.memory_space<vmem>>, vector<1x4x64xf32>
    %38 = vector.shape_cast %37 : vector<1x4x64xf32> to vector<4x64xf32>
    %39 = vector.shape_cast %36 : vector<4x64xf32> to vector<1x4x64xf32>
    tpu.vector_store %arg8[%c0_16, %c0_17, %c0_18], %39 {strides = array<i32>} : memref<1x4x64xf32, #tpu.memory_space<vmem>>, vector<1x4x64xf32>,
    return
  }
  func.func @transform_0(%arg0: i32) -> (i32, i32, i32) {
    %c0_i32 = arith.constant 0 : i32
    %c0_i32_0 = arith.constant 0 : i32
    %c0_i32_1 = arith.constant 0 : i32
    return %arg0, %c0_i32, %c0_i32_0 : i32, i32, i32
  }
  func.func @transform_1(%arg0: i32) -> (i32, i32) {
    %c0_i32 = arith.constant 0 : i32
    %c0_i32_0 = arith.constant 0 : i32
    %c0_i32_1 = arith.constant 0 : i32
    return %c0_i32, %c0_i32_0 : i32, i32
  }
  func.func @transform_2(%arg0: i32) -> (i32, i32) {
    %c0_i32 = arith.constant 0 : i32
    %c0_i32_0 = arith.constant 0 : i32
    %c0_i32_1 = arith.constant 0 : i32
    return %c0_i32, %c0_i32_0 : i32, i32
  }
  func.func @transform_3(%arg0: i32) -> (i32, i32) {
    %c0_i32 = arith.constant 0 : i32
    %c0_i32_0 = arith.constant 0 : i32
    %c0_i32_1 = arith.constant 0 : i32
    return %c0_i32, %c0_i32_0 : i32, i32
  }
  func.func @transform_4(%arg0: i32) -> (i32, i32) {
    %c0_i32 = arith.constant 0 : i32
    %c0_i32_0 = arith.constant 0 : i32
    %c0_i32_1 = arith.constant 0 : i32
    return %c0_i32, %c0_i32_0 : i32, i32
  }
  func.func @transform_5(%arg0: i32) -> (i32, i32) {
    %c0_i32 = arith.constant 0 : i32
    %c0_i32_0 = arith.constant 0 : i32
    %c0_i32_1 = arith.constant 0 : i32
    return %c0_i32, %c0_i32_0 : i32, i32
  }
  func.func @transform_6(%arg0: i32) -> (i32, i32) {
    %c0_i32 = arith.constant 0 : i32
    %c0_i32_0 = arith.constant 0 : i32
    %c0_i32_1 = arith.constant 0 : i32
    return %c0_i32, %c0_i32_0 : i32, i32
  }
  func.func @transform_7(%arg0: i32) -> (i32, i32, i32) {
    %c0_i32 = arith.constant 0 : i32
    %c0_i32_0 = arith.constant 0 : i32
    %c0_i32_1 = arith.constant 0 : i32
    return %arg0, %c0_i32, %c0_i32_0 : i32, i32, i32
  }
}

module attributes {stable_mosaic.version = 11 : i64} {
  func.func @_convt_block_kernel(%arg0: i32, %arg1: memref<1x36x256xf32, #tpu.memory_space<vmem>>, %arg2: memref<4x36xf32, #tpu.memory_space<vmem>>, %arg3: memref<4x1xf32, #tpu.memory_space<vmem>>, %arg4: memref<4x1xf32, #tpu.memory_space<vmem>>, %arg5: memref<4x1xf32, #tpu.memory_space<vmem>>, %arg6: memref<4x1xf32, #tpu.memory_space<vmem>>, %arg7: memref<4x1xf32, #tpu.memory_space<vmem>>, %arg8: memref<1x4x256xf32, #tpu.memory_space<vmem>>) attributes {dimension_semantics = [#tpu.dimension_semantics<parallel>], iteration_bounds = array<i64: 2>, scalar_prefetch = 0 : i64, scratch_operands = 0 : i64, tpu.core_type = #tpu.core_type<tc>, window_params = [{transform_indices = @transform_0, window_bounds = array<i64: 1, 36, 256>}, {pipeline_mode = #tpu.pipeline_mode<synchronous>, transform_indices = @transform_1, window_bounds = array<i64: 4, 36>}, {pipeline_mode = #tpu.pipeline_mode<synchronous>, transform_indices = @transform_2, window_bounds = array<i64: 4, 1>}, {pipeline_mode = #tpu.pipeline_mode<synchronous>, transform_indices = @transform_3, window_bounds = array<i64: 4, 1>}, {pipeline_mode = #tpu.pipeline_mode<synchronous>, transform_indices = @transform_4, window_bounds = array<i64: 4, 1>}, {pipeline_mode = #tpu.pipeline_mode<synchronous>, transform_indices = @transform_5, window_bounds = array<i64: 4, 1>}, {pipeline_mode = #tpu.pipeline_mode<synchronous>, transform_indices = @transform_6, window_bounds = array<i64: 4, 1>}, {transform_indices = @transform_7, window_bounds = array<i64: 1, 4, 256>}]} {
    %c0 = arith.constant 0 : index
    %c0_0 = arith.constant 0 : index
    %0 = vector.load %arg2[%c0, %c0_0] : memref<4x36xf32, #tpu.memory_space<vmem>>, vector<4x36xf32>
    %c0_1 = arith.constant 0 : index
    %c0_2 = arith.constant 0 : index
    %c0_3 = arith.constant 0 : index
    %1 = vector.load %arg1[%c0_1, %c0_2, %c0_3] : memref<1x36x256xf32, #tpu.memory_space<vmem>>, vector<1x36x256xf32>
    %2 = vector.shape_cast %1 : vector<1x36x256xf32> to vector<36x256xf32>
    %cst = arith.constant dense<0.000000e+00> : vector<4x256xf32>
    %3 = tpu.matmul %0, %2, %cst {dimension_numbers = #tpu.dot_dimension_numbers<[1], [0], [0], [1], [0, 0, 1, 1], [], []>, precision = #tpu.contract_precision<fp32>} : vector<4x36xf32>, vector<36x256xf32>, vector<4x256xf32> -> vector<4x256xf32>
    %c0_4 = arith.constant 0 : index
    %c0_5 = arith.constant 0 : index
    %4 = vector.load %arg3[%c0_4, %c0_5] : memref<4x1xf32, #tpu.memory_space<vmem>>, vector<4x1xf32>
    %5 = vector.broadcast %4 : vector<4x1xf32> to vector<4x256xf32>
    %6 = arith.addf %3, %5 : vector<4x256xf32>
    %cst_6 = arith.constant dense<0.000000e+00> : vector<4xf32>
    %7 = vector.multi_reduction <add>, %6, %cst_6 [1] : vector<4x256xf32> to vector<4xf32>
    %8 = vector.shape_cast %7 : vector<4xf32> to vector<4x1xf32>
    %cst_7 = arith.constant 2.560000e+02 : f32
    %9 = vector.broadcast %cst_7 : f32 to vector<4x1xf32>
    %10 = arith.divf %8, %9 : vector<4x1xf32>
    %11 = vector.broadcast %10 : vector<4x1xf32> to vector<4x256xf32>
    %12 = arith.subf %6, %11 : vector<4x256xf32>
    %13 = arith.mulf %12, %12 : vector<4x256xf32>
    %cst_8 = arith.constant dense<0.000000e+00> : vector<4xf32>
    %14 = vector.multi_reduction <add>, %13, %cst_8 [1] : vector<4x256xf32> to vector<4xf32>
    %15 = vector.shape_cast %14 : vector<4xf32> to vector<4x1xf32>
    %cst_9 = arith.constant 2.560000e+02 : f32
    %16 = vector.broadcast %cst_9 : f32 to vector<4x1xf32>
    %17 = arith.divf %15, %16 : vector<4x1xf32>
    %18 = vector.broadcast %10 : vector<4x1xf32> to vector<4x256xf32>
    %19 = arith.subf %6, %18 : vector<4x256xf32>
    %cst_10 = arith.constant 9.99999974E-6 : f32
    %20 = vector.broadcast %cst_10 : f32 to vector<4x1xf32>
    %21 = arith.addf %17, %20 : vector<4x1xf32>
    %22 = math.rsqrt %21 : vector<4x1xf32>
    %23 = vector.broadcast %22 : vector<4x1xf32> to vector<4x256xf32>
    %24 = arith.mulf %19, %23 : vector<4x256xf32>
    %c0_11 = arith.constant 0 : index
    %c0_12 = arith.constant 0 : index
    %25 = vector.load %arg4[%c0_11, %c0_12] : memref<4x1xf32, #tpu.memory_space<vmem>>, vector<4x1xf32>
    %26 = vector.broadcast %25 : vector<4x1xf32> to vector<4x256xf32>
    %27 = arith.mulf %24, %26 : vector<4x256xf32>
    %c0_13 = arith.constant 0 : index
    %c0_14 = arith.constant 0 : index
    %28 = vector.load %arg5[%c0_13, %c0_14] : memref<4x1xf32, #tpu.memory_space<vmem>>, vector<4x1xf32>
    %29 = vector.broadcast %28 : vector<4x1xf32> to vector<4x256xf32>
    %30 = arith.addf %27, %29 : vector<4x256xf32>
    %31 = arith.negf %30 : vector<4x256xf32>
    %32 = math.exp %31 : vector<4x256xf32>
    %cst_15 = arith.constant 1.000000e+00 : f32
    %33 = vector.broadcast %cst_15 : f32 to vector<4x256xf32>
    %34 = arith.addf %33, %32 : vector<4x256xf32>
    %35 = arith.divf %33, %34 : vector<4x256xf32>
    %36 = arith.mulf %30, %35 : vector<4x256xf32>
    %cst_16 = arith.constant dense<0.000000e+00> : vector<4xf32>
    %37 = vector.multi_reduction <add>, %36, %cst_16 [1] : vector<4x256xf32> to vector<4xf32>
    %38 = vector.shape_cast %37 : vector<4xf32> to vector<4x1xf32>
    %cst_17 = arith.constant 2.560000e+02 : f32
    %39 = vector.broadcast %cst_17 : f32 to vector<4x1xf32>
    %40 = arith.divf %38, %39 : vector<4x1xf32>
    %41 = vector.broadcast %40 : vector<4x1xf32> to vector<4x256xf32>
    %42 = arith.subf %36, %41 : vector<4x256xf32>
    %43 = arith.mulf %42, %42 : vector<4x256xf32>
    %cst_18 = arith.constant dense<0.000000e+00> : vector<4xf32>
    %44 = vector.multi_reduction <add>, %43, %cst_18 [1] : vector<4x256xf32> to vector<4xf32>
    %45 = vector.shape_cast %44 : vector<4xf32> to vector<4x1xf32>
    %cst_19 = arith.constant 2.560000e+02 : f32
    %46 = vector.broadcast %cst_19 : f32 to vector<4x1xf32>
    %47 = arith.divf %45, %46 : vector<4x1xf32>
    %48 = vector.broadcast %40 : vector<4x1xf32> to vector<4x256xf32>
    %49 = arith.subf %36, %48 : vector<4x256xf32>
    %cst_20 = arith.constant 9.99999974E-6 : f32
    %50 = vector.broadcast %cst_20 : f32 to vector<4x1xf32>
    %51 = arith.addf %47, %50 : vector<4x1xf32>
    %52 = math.rsqrt %51 : vector<4x1xf32>
    %53 = vector.broadcast %52 : vector<4x1xf32> to vector<4x256xf32>
    %54 = arith.mulf %49, %53 : vector<4x256xf32>
    %c0_21 = arith.constant 0 : index
    %c0_22 = arith.constant 0 : index
    %55 = vector.load %arg6[%c0_21, %c0_22] : memref<4x1xf32, #tpu.memory_space<vmem>>, vector<4x1xf32>
    %56 = vector.broadcast %55 : vector<4x1xf32> to vector<4x256xf32>
    %57 = arith.mulf %54, %56 : vector<4x256xf32>
    %c0_23 = arith.constant 0 : index
    %c0_24 = arith.constant 0 : index
    %58 = vector.load %arg7[%c0_23, %c0_24] : memref<4x1xf32, #tpu.memory_space<vmem>>, vector<4x1xf32>
    %59 = vector.broadcast %58 : vector<4x1xf32> to vector<4x256xf32>
    %60 = arith.addf %57, %59 : vector<4x256xf32>
    %c0_25 = arith.constant 0 : index
    %c0_26 = arith.constant 0 : index
    %c0_27 = arith.constant 0 : index
    %61 = vector.load %arg8[%c0_25, %c0_26, %c0_27] : memref<1x4x256xf32, #tpu.memory_space<vmem>>, vector<1x4x256xf32>
    %62 = vector.shape_cast %61 : vector<1x4x256xf32> to vector<4x256xf32>
    %63 = vector.shape_cast %60 : vector<4x256xf32> to vector<1x4x256xf32>
    tpu.vector_store %arg8[%c0_25, %c0_26, %c0_27], %63 {strides = array<i32>} : memref<1x4x256xf32, #tpu.memory_space<vmem>>, vector<1x4x256xf32>,
    return
  }
  func.func @transform_0(%arg0: i32) -> (i32, i32, i32) {
    %c0_i32 = arith.constant 0 : i32
    %c0_i32_0 = arith.constant 0 : i32
    %c0_i32_1 = arith.constant 0 : i32
    return %arg0, %c0_i32, %c0_i32_0 : i32, i32, i32
  }
  func.func @transform_1(%arg0: i32) -> (i32, i32) {
    %c0_i32 = arith.constant 0 : i32
    %c0_i32_0 = arith.constant 0 : i32
    %c0_i32_1 = arith.constant 0 : i32
    return %c0_i32, %c0_i32_0 : i32, i32
  }
  func.func @transform_2(%arg0: i32) -> (i32, i32) {
    %c0_i32 = arith.constant 0 : i32
    %c0_i32_0 = arith.constant 0 : i32
    %c0_i32_1 = arith.constant 0 : i32
    return %c0_i32, %c0_i32_0 : i32, i32
  }
  func.func @transform_3(%arg0: i32) -> (i32, i32) {
    %c0_i32 = arith.constant 0 : i32
    %c0_i32_0 = arith.constant 0 : i32
    %c0_i32_1 = arith.constant 0 : i32
    return %c0_i32, %c0_i32_0 : i32, i32
  }
  func.func @transform_4(%arg0: i32) -> (i32, i32) {
    %c0_i32 = arith.constant 0 : i32
    %c0_i32_0 = arith.constant 0 : i32
    %c0_i32_1 = arith.constant 0 : i32
    return %c0_i32, %c0_i32_0 : i32, i32
  }
  func.func @transform_5(%arg0: i32) -> (i32, i32) {
    %c0_i32 = arith.constant 0 : i32
    %c0_i32_0 = arith.constant 0 : i32
    %c0_i32_1 = arith.constant 0 : i32
    return %c0_i32, %c0_i32_0 : i32, i32
  }
  func.func @transform_6(%arg0: i32) -> (i32, i32) {
    %c0_i32 = arith.constant 0 : i32
    %c0_i32_0 = arith.constant 0 : i32
    %c0_i32_1 = arith.constant 0 : i32
    return %c0_i32, %c0_i32_0 : i32, i32
  }
  func.func @transform_7(%arg0: i32) -> (i32, i32, i32) {
    %c0_i32 = arith.constant 0 : i32
    %c0_i32_0 = arith.constant 0 : i32
    %c0_i32_1 = arith.constant 0 : i32
    return %arg0, %c0_i32, %c0_i32_0 : i32, i32, i32
  }
}

module attributes {stable_mosaic.version = 11 : i64} {
  func.func @_qkv_conv_kernel(%arg0: i32, %arg1: memref<1x36x256xf32, #tpu.memory_space<vmem>>, %arg2: memref<1x36x256xf32, #tpu.memory_space<vmem>>, %arg3: memref<4x36xf32, #tpu.memory_space<vmem>>, %arg4: memref<8x36xf32, #tpu.memory_space<vmem>>, %arg5: memref<1x4x256xf32, #tpu.memory_space<vmem>>, %arg6: memref<1x8x256xf32, #tpu.memory_space<vmem>>) attributes {dimension_semantics = [#tpu.dimension_semantics<parallel>], iteration_bounds = array<i64: 2>, scalar_prefetch = 0 : i64, scratch_operands = 0 : i64, tpu.core_type = #tpu.core_type<tc>, window_params = [{transform_indices = @transform_0, window_bounds = array<i64: 1, 36, 256>}, {transform_indices = @transform_1, window_bounds = array<i64: 1, 36, 256>}, {pipeline_mode = #tpu.pipeline_mode<synchronous>, transform_indices = @transform_2, window_bounds = array<i64: 4, 36>}, {pipeline_mode = #tpu.pipeline_mode<synchronous>, transform_indices = @transform_3, window_bounds = array<i64: 8, 36>}, {transform_indices = @transform_4, window_bounds = array<i64: 1, 4, 256>}, {transform_indices = @transform_5, window_bounds = array<i64: 1, 8, 256>}]} {
    %c0 = arith.constant 0 : index
    %c0_0 = arith.constant 0 : index
    %0 = vector.load %arg3[%c0, %c0_0] : memref<4x36xf32, #tpu.memory_space<vmem>>, vector<4x36xf32>
    %c0_1 = arith.constant 0 : index
    %c0_2 = arith.constant 0 : index
    %c0_3 = arith.constant 0 : index
    %1 = vector.load %arg1[%c0_1, %c0_2, %c0_3] : memref<1x36x256xf32, #tpu.memory_space<vmem>>, vector<1x36x256xf32>
    %2 = vector.shape_cast %1 : vector<1x36x256xf32> to vector<36x256xf32>
    %cst = arith.constant dense<0.000000e+00> : vector<4x256xf32>
    %3 = tpu.matmul %0, %2, %cst {dimension_numbers = #tpu.dot_dimension_numbers<[1], [0], [0], [1], [0, 0, 1, 1], [], []>, precision = #tpu.contract_precision<fp32>} : vector<4x36xf32>, vector<36x256xf32>, vector<4x256xf32> -> vector<4x256xf32>
    %c0_4 = arith.constant 0 : index
    %c0_5 = arith.constant 0 : index
    %c0_6 = arith.constant 0 : index
    %4 = vector.load %arg5[%c0_4, %c0_5, %c0_6] : memref<1x4x256xf32, #tpu.memory_space<vmem>>, vector<1x4x256xf32>
    %5 = vector.shape_cast %4 : vector<1x4x256xf32> to vector<4x256xf32>
    %6 = vector.shape_cast %3 : vector<4x256xf32> to vector<1x4x256xf32>
    tpu.vector_store %arg5[%c0_4, %c0_5, %c0_6], %6 {strides = array<i32>} : memref<1x4x256xf32, #tpu.memory_space<vmem>>, vector<1x4x256xf32>,
    %c0_7 = arith.constant 0 : index
    %c0_8 = arith.constant 0 : index
    %7 = vector.load %arg4[%c0_7, %c0_8] : memref<8x36xf32, #tpu.memory_space<vmem>>, vector<8x36xf32>
    %c0_9 = arith.constant 0 : index
    %c0_10 = arith.constant 0 : index
    %c0_11 = arith.constant 0 : index
    %8 = vector.load %arg2[%c0_9, %c0_10, %c0_11] : memref<1x36x256xf32, #tpu.memory_space<vmem>>, vector<1x36x256xf32>
    %9 = vector.shape_cast %8 : vector<1x36x256xf32> to vector<36x256xf32>
    %cst_12 = arith.constant dense<0.000000e+00> : vector<8x256xf32>
    %10 = tpu.matmul %7, %9, %cst_12 {dimension_numbers = #tpu.dot_dimension_numbers<[1], [0], [0], [1], [0, 0, 1, 1], [], []>, precision = #tpu.contract_precision<fp32>} : vector<8x36xf32>, vector<36x256xf32>, vector<8x256xf32> -> vector<8x256xf32>
    %c0_13 = arith.constant 0 : index
    %c0_14 = arith.constant 0 : index
    %c0_15 = arith.constant 0 : index
    %11 = vector.load %arg6[%c0_13, %c0_14, %c0_15] : memref<1x8x256xf32, #tpu.memory_space<vmem>>, vector<1x8x256xf32>
    %12 = vector.shape_cast %11 : vector<1x8x256xf32> to vector<8x256xf32>
    %13 = vector.shape_cast %10 : vector<8x256xf32> to vector<1x8x256xf32>
    tpu.vector_store %arg6[%c0_13, %c0_14, %c0_15], %13 {strides = array<i32>} : memref<1x8x256xf32, #tpu.memory_space<vmem>>, vector<1x8x256xf32>,
    return
  }
  func.func @transform_0(%arg0: i32) -> (i32, i32, i32) {
    %c0_i32 = arith.constant 0 : i32
    %c0_i32_0 = arith.constant 0 : i32
    %c0_i32_1 = arith.constant 0 : i32
    return %arg0, %c0_i32, %c0_i32_0 : i32, i32, i32
  }
  func.func @transform_1(%arg0: i32) -> (i32, i32, i32) {
    %c0_i32 = arith.constant 0 : i32
    %c0_i32_0 = arith.constant 0 : i32
    %c0_i32_1 = arith.constant 0 : i32
    return %arg0, %c0_i32, %c0_i32_0 : i32, i32, i32
  }
  func.func @transform_2(%arg0: i32) -> (i32, i32) {
    %c0_i32 = arith.constant 0 : i32
    %c0_i32_0 = arith.constant 0 : i32
    %c0_i32_1 = arith.constant 0 : i32
    return %c0_i32, %c0_i32_0 : i32, i32
  }
  func.func @transform_3(%arg0: i32) -> (i32, i32) {
    %c0_i32 = arith.constant 0 : i32
    %c0_i32_0 = arith.constant 0 : i32
    %c0_i32_1 = arith.constant 0 : i32
    return %c0_i32, %c0_i32_0 : i32, i32
  }
  func.func @transform_4(%arg0: i32) -> (i32, i32, i32) {
    %c0_i32 = arith.constant 0 : i32
    %c0_i32_0 = arith.constant 0 : i32
    %c0_i32_1 = arith.constant 0 : i32
    return %arg0, %c0_i32, %c0_i32_0 : i32, i32, i32
  }
  func.func @transform_5(%arg0: i32) -> (i32, i32, i32) {
    %c0_i32 = arith.constant 0 : i32
    %c0_i32_0 = arith.constant 0 : i32
    %c0_i32_1 = arith.constant 0 : i32
    return %arg0, %c0_i32, %c0_i32_0 : i32, i32, i32
  }
}

module attributes {stable_mosaic.version = 11 : i64} {
  func.func @_attn_res_norm_kernel(%arg0: i32, %arg1: memref<1x2x2x256xf32, #tpu.memory_space<vmem>>, %arg2: memref<1x2x2x256xf32, #tpu.memory_space<vmem>>, %arg3: memref<1x2x2x256xf32, #tpu.memory_space<vmem>>, %arg4: memref<1x2x2x256xf32, #tpu.memory_space<vmem>>, %arg5: memref<2x2x1xf32, #tpu.memory_space<vmem>>, %arg6: memref<2x2x1xf32, #tpu.memory_space<vmem>>, %arg7: memref<1x1x1xf32, #tpu.memory_space<vmem>>, %arg8: memref<1x2x2x256xf32, #tpu.memory_space<vmem>>) attributes {dimension_semantics = [#tpu.dimension_semantics<parallel>], iteration_bounds = array<i64: 2>, scalar_prefetch = 0 : i64, scratch_operands = 0 : i64, tpu.core_type = #tpu.core_type<tc>, window_params = [{transform_indices = @transform_0, window_bounds = array<i64: 1, 2, 2, 256>}, {transform_indices = @transform_1, window_bounds = array<i64: 1, 2, 2, 256>}, {transform_indices = @transform_2, window_bounds = array<i64: 1, 2, 2, 256>}, {transform_indices = @transform_3, window_bounds = array<i64: 1, 2, 2, 256>}, {pipeline_mode = #tpu.pipeline_mode<synchronous>, transform_indices = @transform_4, window_bounds = array<i64: 2, 2, 1>}, {pipeline_mode = #tpu.pipeline_mode<synchronous>, transform_indices = @transform_5, window_bounds = array<i64: 2, 2, 1>}, {transform_indices = @transform_6, window_bounds = array<i64: 1, 1, 1>}, {transform_indices = @transform_7, window_bounds = array<i64: 1, 2, 2, 256>}]} {
    %c0 = arith.constant 0 : index
    %c0_0 = arith.constant 0 : index
    %c0_1 = arith.constant 0 : index
    %c0_2 = arith.constant 0 : index
    %0 = vector.load %arg2[%c0, %c0_0, %c0_1, %c0_2] : memref<1x2x2x256xf32, #tpu.memory_space<vmem>>, vector<1x2x2x256xf32>
    %1 = vector.shape_cast %0 : vector<1x2x2x256xf32> to vector<2x2x256xf32>
    %cst = arith.constant 6.250000e-02 : f32
    %2 = vector.broadcast %cst : f32 to vector<2x2x256xf32>
    %3 = arith.mulf %1, %2 : vector<2x2x256xf32>
    %c0_3 = arith.constant 0 : index
    %c0_4 = arith.constant 0 : index
    %c0_5 = arith.constant 0 : index
    %c0_6 = arith.constant 0 : index
    %4 = vector.load %arg3[%c0_3, %c0_4, %c0_5, %c0_6] : memref<1x2x2x256xf32, #tpu.memory_space<vmem>>, vector<1x2x2x256xf32>
    %5 = vector.shape_cast %4 : vector<1x2x2x256xf32> to vector<2x2x256xf32>
    %c0_7 = arith.constant 0 : index
    %c0_8 = arith.constant 0 : index
    %c0_9 = arith.constant 0 : index
    %c0_10 = arith.constant 0 : index
    %6 = vector.load %arg4[%c0_7, %c0_8, %c0_9, %c0_10] : memref<1x2x2x256xf32, #tpu.memory_space<vmem>>, vector<1x2x2x256xf32>
    %7 = vector.shape_cast %6 : vector<1x2x2x256xf32> to vector<2x2x256xf32>
    "tpu.trace_start"() <{level = 10 : i32, message = "hld,hmd->hlm"}> : () -> ()
    %cst_11 = arith.constant dense<0.000000e+00> : vector<2x2x2xf32>
    %8 = tpu.matmul %3, %5, %cst_11 {dimension_numbers = #tpu.dot_dimension_numbers<[2], [2], [1], [1], [0, 0, 0, 1, 1, 1], [0], [0]>, precision = #tpu.contract_precision<fp32>} : vector<2x2x256xf32>, vector<2x2x256xf32>, vector<2x2x2xf32> -> vector<2x2x2xf32>
    "tpu.trace_stop"() : () -> ()
    %cst_12 = arith.constant dense<0xFF800000> : vector<2x2xf32>
    %9 = vector.multi_reduction <maximumf>, %8, %cst_12 [2] : vector<2x2x2xf32> to vector<2x2xf32>
    %10 = vector.shape_cast %9 : vector<2x2xf32> to vector<2x2x1xf32>
    %11 = vector.broadcast %10 : vector<2x2x1xf32> to vector<2x2x2xf32>
    %12 = arith.subf %8, %11 : vector<2x2x2xf32>
    %13 = math.exp %12 : vector<2x2x2xf32>
    %cst_13 = arith.constant dense<0.000000e+00> : vector<2x2xf32>
    %14 = vector.multi_reduction <add>, %13, %cst_13 [2] : vector<2x2x2xf32> to vector<2x2xf32>
    %15 = vector.shape_cast %14 : vector<2x2xf32> to vector<2x2x1xf32>
    %16 = vector.broadcast %15 : vector<2x2x1xf32> to vector<2x2x2xf32>
    %17 = arith.divf %13, %16 : vector<2x2x2xf32>
    "tpu.trace_start"() <{level = 10 : i32, message = "hlm,hmd->hld"}> : () -> ()
    %cst_14 = arith.constant dense<0.000000e+00> : vector<2x2x256xf32>
    %18 = tpu.matmul %17, %7, %cst_14 {dimension_numbers = #tpu.dot_dimension_numbers<[2], [1], [1], [2], [0, 0, 0, 1, 1, 2], [0], [0]>, precision = #tpu.contract_precision<fp32>} : vector<2x2x2xf32>, vector<2x2x256xf32>, vector<2x2x256xf32> -> vector<2x2x256xf32>
    "tpu.trace_stop"() : () -> ()
    %c0_15 = arith.constant 0 : index
    %c0_16 = arith.constant 0 : index
    %c0_17 = arith.constant 0 : index
    %c0_18 = arith.constant 0 : index
    %19 = vector.load %arg1[%c0_15, %c0_16, %c0_17, %c0_18] : memref<1x2x2x256xf32, #tpu.memory_space<vmem>>, vector<1x2x2x256xf32>
    %20 = vector.shape_cast %19 : vector<1x2x2x256xf32> to vector<2x2x256xf32>
    %21 = arith.addf %20, %18 : vector<2x2x256xf32>
    %cst_19 = arith.constant dense<0.000000e+00> : vector<2x2xf32>
    %22 = vector.multi_reduction <add>, %21, %cst_19 [2] : vector<2x2x256xf32> to vector<2x2xf32>
    %23 = vector.shape_cast %22 : vector<2x2xf32> to vector<2x2x1xf32>
    %cst_20 = arith.constant 2.560000e+02 : f32
    %24 = vector.broadcast %cst_20 : f32 to vector<2x2x1xf32>
    %25 = arith.divf %23, %24 : vector<2x2x1xf32>
    %26 = vector.broadcast %25 : vector<2x2x1xf32> to vector<2x2x256xf32>
    %27 = arith.subf %21, %26 : vector<2x2x256xf32>
    %28 = arith.mulf %27, %27 : vector<2x2x256xf32>
    %cst_21 = arith.constant dense<0.000000e+00> : vector<2x2xf32>
    %29 = vector.multi_reduction <add>, %28, %cst_21 [2] : vector<2x2x256xf32> to vector<2x2xf32>
    %30 = vector.shape_cast %29 : vector<2x2xf32> to vector<2x2x1xf32>
    %cst_22 = arith.constant 2.560000e+02 : f32
    %31 = vector.broadcast %cst_22 : f32 to vector<2x2x1xf32>
    %32 = arith.divf %30, %31 : vector<2x2x1xf32>
    %33 = vector.broadcast %25 : vector<2x2x1xf32> to vector<2x2x256xf32>
    %34 = arith.subf %21, %33 : vector<2x2x256xf32>
    %cst_23 = arith.constant 9.99999974E-6 : f32
    %35 = vector.broadcast %cst_23 : f32 to vector<2x2x1xf32>
    %36 = arith.addf %32, %35 : vector<2x2x1xf32>
    %37 = math.rsqrt %36 : vector<2x2x1xf32>
    %38 = vector.broadcast %37 : vector<2x2x1xf32> to vector<2x2x256xf32>
    %39 = arith.mulf %34, %38 : vector<2x2x256xf32>
    %c0_24 = arith.constant 0 : index
    %c0_25 = arith.constant 0 : index
    %c0_26 = arith.constant 0 : index
    %40 = vector.load %arg5[%c0_24, %c0_25, %c0_26] : memref<2x2x1xf32, #tpu.memory_space<vmem>>, vector<2x2x1xf32>
    %41 = vector.broadcast %40 : vector<2x2x1xf32> to vector<2x2x256xf32>
    %42 = arith.mulf %39, %41 : vector<2x2x256xf32>
    %c0_27 = arith.constant 0 : index
    %c0_28 = arith.constant 0 : index
    %c0_29 = arith.constant 0 : index
    %43 = vector.load %arg6[%c0_27, %c0_28, %c0_29] : memref<2x2x1xf32, #tpu.memory_space<vmem>>, vector<2x2x1xf32>
    %44 = vector.broadcast %43 : vector<2x2x1xf32> to vector<2x2x256xf32>
    %45 = arith.addf %42, %44 : vector<2x2x256xf32>
    %c0_30 = arith.constant 0 : index
    %c0_31 = arith.constant 0 : index
    %c0_32 = arith.constant 0 : index
    %46 = vector.load %arg7[%c0_30, %c0_31, %c0_32] : memref<1x1x1xf32, #tpu.memory_space<vmem>>, vector<1x1x1xf32>
    %47 = vector.broadcast %46 : vector<1x1x1xf32> to vector<2x2x256xf32>
    %48 = arith.mulf %45, %47 : vector<2x2x256xf32>
    %c0_33 = arith.constant 0 : index
    %c0_34 = arith.constant 0 : index
    %c0_35 = arith.constant 0 : index
    %c0_36 = arith.constant 0 : index
    %49 = vector.load %arg8[%c0_33, %c0_34, %c0_35, %c0_36] : memref<1x2x2x256xf32, #tpu.memory_space<vmem>>, vector<1x2x2x256xf32>
    %50 = vector.shape_cast %49 : vector<1x2x2x256xf32> to vector<2x2x256xf32>
    %51 = vector.shape_cast %48 : vector<2x2x256xf32> to vector<1x2x2x256xf32>
    tpu.vector_store %arg8[%c0_33, %c0_34, %c0_35, %c0_36], %51 {strides = array<i32>} : memref<1x2x2x256xf32, #tpu.memory_space<vmem>>, vector<1x2x2x256xf32>,
    return
  }
  func.func @transform_0(%arg0: i32) -> (i32, i32, i32, i32) {
    %c0_i32 = arith.constant 0 : i32
    %c0_i32_0 = arith.constant 0 : i32
    %c0_i32_1 = arith.constant 0 : i32
    %c0_i32_2 = arith.constant 0 : i32
    return %arg0, %c0_i32, %c0_i32_0, %c0_i32_1 : i32, i32, i32, i32
  }
  func.func @transform_1(%arg0: i32) -> (i32, i32, i32, i32) {
    %c0_i32 = arith.constant 0 : i32
    %c0_i32_0 = arith.constant 0 : i32
    %c0_i32_1 = arith.constant 0 : i32
    %c0_i32_2 = arith.constant 0 : i32
    return %arg0, %c0_i32, %c0_i32_0, %c0_i32_1 : i32, i32, i32, i32
  }
  func.func @transform_2(%arg0: i32) -> (i32, i32, i32, i32) {
    %c0_i32 = arith.constant 0 : i32
    %c0_i32_0 = arith.constant 0 : i32
    %c0_i32_1 = arith.constant 0 : i32
    %c0_i32_2 = arith.constant 0 : i32
    return %arg0, %c0_i32, %c0_i32_0, %c0_i32_1 : i32, i32, i32, i32
  }
  func.func @transform_3(%arg0: i32) -> (i32, i32, i32, i32) {
    %c0_i32 = arith.constant 0 : i32
    %c0_i32_0 = arith.constant 0 : i32
    %c0_i32_1 = arith.constant 0 : i32
    %c0_i32_2 = arith.constant 0 : i32
    return %arg0, %c0_i32, %c0_i32_0, %c0_i32_1 : i32, i32, i32, i32
  }
  func.func @transform_4(%arg0: i32) -> (i32, i32, i32) {
    %c0_i32 = arith.constant 0 : i32
    %c0_i32_0 = arith.constant 0 : i32
    %c0_i32_1 = arith.constant 0 : i32
    %c0_i32_2 = arith.constant 0 : i32
    return %c0_i32, %c0_i32_0, %c0_i32_1 : i32, i32, i32
  }
  func.func @transform_5(%arg0: i32) -> (i32, i32, i32) {
    %c0_i32 = arith.constant 0 : i32
    %c0_i32_0 = arith.constant 0 : i32
    %c0_i32_1 = arith.constant 0 : i32
    %c0_i32_2 = arith.constant 0 : i32
    return %c0_i32, %c0_i32_0, %c0_i32_1 : i32, i32, i32
  }
  func.func @transform_6(%arg0: i32) -> (i32, i32, i32) {
    %c0_i32 = arith.constant 0 : i32
    %c0_i32_0 = arith.constant 0 : i32
    %c0_i32_1 = arith.constant 0 : i32
    return %arg0, %c0_i32, %c0_i32_0 : i32, i32, i32
  }
  func.func @transform_7(%arg0: i32) -> (i32, i32, i32, i32) {
    %c0_i32 = arith.constant 0 : i32
    %c0_i32_0 = arith.constant 0 : i32
    %c0_i32_1 = arith.constant 0 : i32
    %c0_i32_2 = arith.constant 0 : i32
    return %arg0, %c0_i32, %c0_i32_0, %c0_i32_1 : i32, i32, i32, i32
  }
}

</mosaic_0001>

<bundles_post_ra>
// kernel: f.4
= control target key start
LH: loop header
LB: loop body
LE: loop exit
PB: predicated region body
PF: predicated region fallthrough
CT: control target
= control target key end

     0   :  { %s1080_s24 = smov 0   ;;  %s1223_s0 = inlined_call_operand.vmem [shape: f32[2,36,64], index: 0, kind: input, shape index: {}]   ;;  %s1224_s1 = inlined_call_operand.vmem [shape: f32[4,36], index: 1, kind: input, shape index: {}]   ;;  %s1225_s2 = inlined_call_operand.vmem [shape: f32[4,1], index: 2, kind: input, shape index: {}]   ;;  %s1226_s3 = inlined_call_operand.vmem [shape: f32[4,1], index: 3, kind: input, shape index: {}, may-alias: {3,5}]   ;;  %s1227_s4 = inlined_call_operand.vmem [shape: f32[4,1], index: 4, kind: input, shape index: {}, may-alias: {4,6}]   ;;  %s1228_s5 = inlined_call_operand.vmem [shape: f32[4,1], index: 5, kind: input, shape index: {}, may-alias: {3,5}]   ;;  %s1229_s6 = inlined_call_operand.vmem [shape: f32[4,1], index: 6, kind: input, shape index: {}, may-alias: {4,6}]   ;;  %s1230_s7 = inlined_call_operand.vmem [shape: f32[2,4,64], index: 7, kind: output, shape index: {}]  }
   0x1 LB: > { %s885_s25 = sadd.s32 4294967295, %s1035_s24   ;;  %p889_p0 = scmp.ge.s32.totalorder %s1035_s24, 1  ;;  %s1035_s24 = sphi %s1080_s24, %s17_s24  }
   0x2   : > { %p237_p1 = scmp.lt.s32.totalorder %s1035_s24, 3 }
   0x4   : > { %p238_p2 = pnand %p889_p0, %p237_p1 }
   0x5   : > { %p268_p3 = scmp.lt.s32.totalorder (!%p238_p2), %s885_s25, 1 }
   0x6   : > { %241 = sbr.rel (%p238_p2) target bundleno = 598 (0x256), region = 48 }
   0xb   : > { %v277_v0 = vld [vmem:[%s1224_s1] sm:$0xf]  ;;  %v1037_v1 = vmov 0.0   ;;  %vm289_vm0 = vcmask 293888   ;;  %s1232_s25 = smov (!%p268_p3, %s885_s25), 1  ;;  %vm1038_vm1 = vmmov 0  }
   0xc   : > { %931 = vmatprep.subr.mxu0 %v1037_v1  ;;  %944 = vmatprep.subr.mxu1 %v1037_v1  ;;  %v283_v2 = vld [vmem:[%s1225_s2] sm:$0xf]  ;;  %v291_v3 = vsel %vm289_vm0, %v277_v0, 0  ;;  %v1039_v5 = vmov 0   ;;  %s1009_s28 = smul.u32 40, %s1232_s25  ;;  %vm293_vm2 = vcmask 1043456  }
   0xd   : > { %941 = vmatprep.mubr.msk.f32.mxu0 %vm1038_vm1, %v1037_v1  ;;  %954 = vmatprep.mubr.msk.f32.mxu1 %vm1038_vm1, %v1037_v1  ;;  %v1102_v4 = vand.u32 4294901760, %v291_v3  ;;  %v810_v41 = vld [vmem:[%s1226_s3] sm:$0xf]  ;;  %vm795_vm3 = vcmask 519168   ;;  %s891_s13 = sshll.u32 %s1232_s25, 2 }
   0xe   : > { %1021 = vset.pattern.permute.xlu0 %v1039_v5  ;;  %1022 = vset.pattern.permute.xlu1 %v1039_v5  ;;  %s272_s8 = scalar_lea.vmem %s1223_s0, %s1009_s28  ;;  %s276_s16 = scalar_lea.vmem %s1230_s7, %s891_s13 }
   0xf   : > { %286 = vperm.xlu0 %1021, %v283_v2   ;;  %v1106_v6 = vsub.f32 %v291_v3, %v1102_v4  ;;  %v282_v7 = vld [vmem:[%s272_s8 + $0x20] sm:$0xf]  ;;  %v281_v8 = vld [vmem:[%s272_s8 + $0x18] sm:$0xff]  ;;  %v280_v9 = vld [vmem:[%s272_s8 + $0x10] sm:$0xff]  ;;  %813 = vperm.xlu1 %1022, %v810_v41  }
  0x10   : > { %v295_v10 = vsel %vm293_vm2, %v282_v7, 0  ;;  %v1111_v11 = vand.u32 4294901760, %v281_v8  ;;  %v1113_v12 = vand.u32 4294901760, %v280_v9  ;;  %v279_v13 = vld [vmem:[%s272_s8 + $0x8] sm:$0xff]  ;;  %v278_v14 = vld [vmem:[%s272_s8] sm:$0xff] }
  0x11   : > { %v1115_v15 = vand.u32 4294901760, %v295_v10  ;;  %v1117_v16 = vand.u32 4294901760, %v279_v13  ;;  %v1119_v17 = vand.u32 4294901760, %v278_v14  ;;  %v369_v18 = vand.u32 4294901760, %v1106_v6  ;;  %v817_v3 = vld [vmem:[%s1227_s4] sm:$0xf] }
  0x12   : > { %v1123_v19 = vsub.f32 %v281_v8, %v1111_v11  ;;  %v1126_v20 = vsub.f32 %v280_v9, %v1113_v12 }
  0x13   : > { %932 = vmatpush3.msra.mxu0 %v1115_v15  ;;  %v401_v21 = vsub.f32 %v295_v10, %v1115_v15  ;;  %v1131_v22 = vsub.f32 %v279_v13, %v1117_v16  ;;  %v1134_v23 = vsub.f32 %v278_v14, %v1119_v17  ;;  %v370_v27 = vsub.f32 %v1106_v6, %v369_v18 }
  0x14   : > { %933 = vmatprep.subr.mxu0 %v1037_v1  ;;  %v409_v24 = vand.u32 4294901760, %v1123_v19  ;;  %v416_v25 = vand.u32 4294901760, %v1126_v20 }
  0x15   : > { %934 = vmatpush3.msra.mxu0 %v1111_v11  ;;  %v402_v26 = vand.u32 4294901760, %v401_v21  ;;  %v423_v28 = vand.u32 4294901760, %v1131_v22  ;;  %v430_v32 = vand.u32 4294901760, %v1134_v23  ;;  %v371_v34 = vand.u32 4294901760, %v370_v27 }
  0x16   : > { %935 = vmatprep.subr.mxu0 %v1037_v1  ;;  %v410_v29 = vsub.f32 %v1123_v19, %v409_v24  ;;  %v417_v31 = vsub.f32 %v1126_v20, %v416_v25 }
  0x17   : > { %936 = vmatpush3.msra.mxu0 %v1113_v12  ;;  %v403_v30 = vsub.f32 %v401_v21, %v402_v26  ;;  %v424_v36 = vsub.f32 %v1131_v22, %v423_v28  ;;  %v431_v38 = vsub.f32 %v1134_v23, %v430_v32 }
  0x18   : > { %937 = vmatprep.subr.mxu0 %v1037_v1  ;;  %v411_v35 = vand.u32 4294901760, %v410_v29  ;;  %v418_v37 = vand.u32 4294901760, %v417_v31 }
  0x19   : > { %938 = vmatpush3.msra.mxu0 %v1117_v16  ;;  %v404_v33 = vand.u32 4294901760, %v403_v30  ;;  %v425_v39 = vand.u32 4294901760, %v424_v36  ;;  %v432_v40 = vand.u32 4294901760, %v431_v38 }
  0x1a   : > { %939 = vmatprep.subr.mxu0 %v1037_v1 }
  0x1b   : > { %940 = vmatpush3.msra.mxu0 %v1119_v17  ;;  %945 = vmatpush3.msra.mxu1 %v404_v33 }
  0x1c   : > { %946 = vmatprep.subr.mxu1 %v1037_v1  ;;  %957 = vmatprep.subr.mxu0 %v1037_v1 }
  0x1d   : > { %942 = vmatmul.mubr.f32.vlgmr.msra.gmra.mxu0 %v371_v34  ;;  %947 = vmatpush3.msra.mxu1 %v411_v35 }
  0x1e   : > { %958 = vmatpush3.msra.mxu0 %v401_v21  ;;  %948 = vmatprep.subr.mxu1 %v1037_v1 }
  0x1f   : > { %959 = vmatprep.subr.mxu0 %v1037_v1  ;;  %949 = vmatpush3.msra.mxu1 %v418_v37 }
  0x20   : > { %960 = vmatpush3.msra.mxu0 %v1123_v19  ;;  %950 = vmatprep.subr.mxu1 %v1037_v1 }
  0x21   : > { %961 = vmatprep.subr.mxu0 %v1037_v1  ;;  %951 = vmatpush3.msra.mxu1 %v425_v39 }
  0x22   : > { %962 = vmatpush3.msra.mxu0 %v1126_v20  ;;  %952 = vmatprep.subr.mxu1 %v1037_v1 }
  0x23   : > { %963 = vmatprep.subr.mxu0 %v1037_v1  ;;  %953 = vmatpush3.msra.mxu1 %v432_v40 }
  0x24   : > { %964 = vmatpush3.msra.mxu0 %v1131_v22  ;;  %955 = vmatmul.mubr.f32.vlgmr.msra.gmra.mxu1 %v1102_v4 }
  0x25   : > { %965 = vmatprep.subr.mxu0 %v1037_v1  ;;  %970 = vmatprep.subr.mxu1 %v1037_v1 }
  0x26   : > { %966 = vmatpush3.msra.mxu0 %v1134_v23  ;;  %971 = vmatpush3.msra.mxu1 %v1115_v15 }
  0x27   : > { %967 = vmatprep.mubr.msk.f32.mxu0 %vm1038_vm1, %v1037_v1  ;;  %972 = vmatprep.subr.mxu1 %v1037_v1 }
  0x28   : > { %983 = vmatprep.subr.mxu0 %v1037_v1  ;;  %968 = vmatmul.mubr.f32.vlgmr.msra.gmra.mxu0 %v1106_v6 }
  0x29   : > { %973 = vmatpush3.msra.mxu1 %v1111_v11  ;;  %984 = vmatpush3.msra.mxu0 %v402_v26 }
  0x2a   : > { %974 = vmatprep.subr.mxu1 %v1037_v1  ;;  %985 = vmatprep.subr.mxu0 %v1037_v1 }
  0x2b   : > { %975 = vmatpush3.msra.mxu1 %v1113_v12  ;;  %986 = vmatpush3.msra.mxu0 %v409_v24 }
  0x2c   : > { %976 = vmatprep.subr.mxu1 %v1037_v1  ;;  %987 = vmatprep.subr.mxu0 %v1037_v1 }
  0x2d   : > { %977 = vmatpush3.msra.mxu1 %v1117_v16  ;;  %988 = vmatpush3.msra.mxu0 %v416_v25 }
  0x2e   : > { %978 = vmatprep.subr.mxu1 %v1037_v1  ;;  %989 = vmatprep.subr.mxu0 %v1037_v1 }
  0x2f   : > { %979 = vmatpush3.msra.mxu1 %v1119_v17  ;;  %980 = vmatprep.mubr.msk.f32.mxu1 %vm1038_vm1, %v1037_v1 }
  0x30   : > { %990 = vmatpush3.msra.mxu0 %v423_v28  ;;  %981 = vmatmul.mubr.f32.vlgmr.msra.gmra.mxu1 %v369_v18 }
  0x31   : > { %991 = vmatprep.subr.mxu0 %v1037_v1  ;;  %996 = vmatprep.subr.mxu1 %v1037_v1 }
  0x32   : > { %992 = vmatpush3.msra.mxu0 %v430_v32  ;;  %993 = vmatprep.mubr.msk.f32.mxu0 %vm1038_vm1, %v1037_v1 }
  0x33   : > { %997 = vmatpush3.msra.mxu1 %v1115_v15  ;;  %994 = vmatmul.mubr.f32.vlgmr.msra.gmra.mxu0 %v1102_v4 }
  0x34   : > { %998 = vmatprep.subr.mxu1 %v1037_v1  ;;  %1006 = vmatprep.mubr.msk.f32.mxu1 %vm1038_vm1, %v1037_v1 }
  0x35   : > { %999 = vmatpush3.msra.mxu1 %v1111_v11 }
  0x36   : > { %1000 = vmatprep.subr.mxu1 %v1037_v1 }
  0x37   : > { %1001 = vmatpush3.msra.mxu1 %v1113_v12 }
  0x38   : > { %1002 = vmatprep.subr.mxu1 %v1037_v1 }
  0x39   : > { %1003 = vmatpush3.msra.mxu1 %v1117_v16 }
  0x3a   : > { %1004 = vmatprep.subr.mxu1 %v1037_v1 }
  0x3b   : > { %1005 = vmatpush3.msra.mxu1 %v1119_v17 }
  0x3c   : > { %1007 = vmatmul.mubr.f32.vlgmr.msra.gmra.mxu1 %v1102_v4 }
  0x8a   : > { %v287_v47 = vpop.permute.xlu0 %286  ;;  %v814_v4 = vpop.permute.xlu1 %813 }
  0xdd   : > { %v373_v42 = vpop.f32.mrf.mxu0 }
  0xde   : > { %v374_v49 = vadd.f32 %v373_v42, %v287_v47 }
  0xdf   : > { %v943_v43 = vpop.f32.mrf.mxu0 }
  0xe4   : > { %v469_v44 = vpop.f32.mrf.mxu1 }
  0xe5   : > { %v470_v51 = vadd.f32 %v469_v44, %v374_v49 }
  0xe6   : > { %v956_v45 = vpop.f32.mrf.mxu1 }
  0xe8   : > { %v551_v46 = vpop.f32.mrf.mxu0 }
  0xe9   : > { %v552_v54 = vadd.f32 %v551_v46, %v470_v51 }
  0xea   : > { %v969_v48 = vpop.f32.mrf.mxu0 }
  0xf0   : > { %v629_v50 = vpop.f32.mrf.mxu1 }
  0xf1   : > { %v630_v56 = vadd.f32 %v629_v50, %v552_v54 }
  0xf2   : > { %v982_v52 = vpop.f32.mrf.mxu1 }
  0xf3   : > { %v715_v53 = vpop.f32.mrf.mxu0 }
  0xf4   : > { %v716_v57 = vadd.f32 %v715_v53, %v630_v56 }
  0xf5   : > { %v995_v55 = vpop.f32.mrf.mxu0 }
  0xfc   : > { %v791_v58 = vpop.f32.mrf.mxu1 }
  0xfd   : > { %v792_v59 = vadd.f32 %v791_v58, %v716_v57 }
  0xfe   : > { %v1008_v60 = vpop.f32.mrf.mxu1 }
  0xff   : > { %v796_v61 = vsel %vm795_vm3, %v792_v59, 0.0 }
 0x100   : > { %797 = vadd.xlane.f32.xlu0 %v796_v61 }
 0x189   : > { %v798_v62 = vpop.xlane.xlu0 %797 }
 0x18a   : > { %v800_v63 = vmul.f32 0.015625, %v798_v62 }
 0x18c   : > { %v801_v0 = vsub.f32 %v792_v59, %v800_v63 }
 0x18e   : > { %v802_v1 = vmul.f32 %v801_v0, %v801_v0 }
 0x190   : > { %v803_v2 = vsel %vm795_vm3, %v802_v1, 0.0 }
 0x191   : > { %804 = vadd.xlane.f32.xlu1 %v803_v2 }
 0x1a2   : > { %820 = vperm.xlu1 %1022, %v817_v3  }
 0x21a   : > { %v805_v5 = vpop.xlane.xlu1 %804 }
 0x21b   : > { %v806_v6 = vmul.f32 0.015625, %v805_v5 }
 0x21d   : > { %v807_v7 = vadd.f32 1e-05, %v806_v6 }
 0x21e   : > { %v821_v11 = vpop.permute.xlu1 %820 }
 0x21f   : > { %1023 = vrsqrt.f32 %v807_v7 }
 0x22c   : > { %v1024_v8 = vpop.eup %1023 }
 0x22d   : > { %v809_v9 = vmul.f32 %v1024_v8, %v801_v0 }
 0x22f   : > { %v816_v10 = vmul.f32 %v814_v4, %v809_v9 }
 0x231   : > { %v823_v12 = vadd.f32 %v821_v11, %v816_v10 }
 0x233   : > { %v892_v13 = vmul.f32 -1.442695, %v823_v12 }
 0x235   : > { %1025 = vpow2.f32 %v892_v13 }
 0x242   : > { %v1026_v14 = vpop.eup %1025 }
 0x243   : > { %v827_v15 = vadd.f32 1.0, %v1026_v14 }
 0x245   : > { %1027 = vrcp.f32 %v827_v15 }
 0x252   : > { %v1028_v16 = vpop.eup %1027 }
 0x253   : > { %v830_v17 = vmul.f32 %v1028_v16, %v823_v12 }
 0x255   : > { %831 = vst.msk [vmem:[%s276_s16] sm:$0xf] %vm795_vm3, %v830_v17 }
 0x256 PF: > { %s17_s24 = sadd.s32 1, %s1035_s24  }
 0x257   : > { %p14_p4 = scmp.ge.s32.totalorder %s17_s24, 4  }
 0x259   :  { %16 = sbr.rel (!%p14_p4) target bundleno = 1 (0x1), region = 78 }

// kernel: f.5
= control target key start
LH: loop header
LB: loop body
LE: loop exit
PB: predicated region body
PF: predicated region fallthrough
CT: control target
= control target key end

     0   :  { %s1111_s24 = smov 0   ;;  %s1313_s0 = inlined_call_operand.vmem [shape: f32[2,36,256], index: 0, kind: input, shape index: {}]   ;;  %s1314_s1 = inlined_call_operand.vmem [shape: f32[4,36], index: 1, kind: input, shape index: {}]   ;;  %s1315_s2 = inlined_call_operand.vmem [shape: f32[4,1], index: 2, kind: input, shape index: {}]   ;;  %s1316_s3 = inlined_call_operand.vmem [shape: f32[4,1], index: 3, kind: input, shape index: {}]   ;;  %s1317_s4 = inlined_call_operand.vmem [shape: f32[4,1], index: 4, kind: input, shape index: {}]   ;;  %s1318_s5 = inlined_call_operand.vmem [shape: f32[4,1], index: 5, kind: input, shape index: {}]   ;;  %s1319_s6 = inlined_call_operand.vmem [shape: f32[4,1], index: 6, kind: input, shape index: {}]   ;;  %s1320_s7 = inlined_call_operand.vmem [shape: f32[2,4,256], index: 7, kind: output, shape index: {}]  }
   0x1 LB: > { %s1023_s25 = sadd.s32 4294967295, %s1067_s24   ;;  %p1027_p0 = scmp.ge.s32.totalorder %s1067_s24, 1  ;;  %s1067_s24 = sphi %s1111_s24, %s17_s24  }
   0x2   : > { %p237_p1 = scmp.lt.s32.totalorder %s1067_s24, 3 }
   0x4   : > { %p238_p2 = pnand %p1027_p0, %p237_p1 }
   0x5   : > { %p269_p3 = scmp.lt.s32.totalorder (!%p238_p2), %s1023_s25, 1 }
   0x6   : > { %241 = sbr.rel (%p238_p2) target bundleno = 920 (0x398), region = 48 }
   0xb   : > { %v279_v0 = vld [vmem:[%s1314_s1] sm:$0xf]  ;;  %vm296_vm0 = vcmask 293888   ;;  %v1069_v1 = vmov 0.0   ;;  %s1322_s25 = smov (!%p269_p3, %s1023_s25), 1  ;;  %v1070_v5 = vmov 0  }
   0xc   : > { %381 = vmatprep.mubr.f32.mxu0 %v1069_v1  ;;  %v298_v2 = vsel %vm296_vm0, %v279_v0, 0  ;;  %507 = vmatprep.mubr.f32.mxu1 %v1069_v1  ;;  %v290_v3 = vld [vmem:[%s1315_s2] sm:$0xf]  ;;  %s1036_s30 = smul.u32 80, %s1322_s25  ;;  %vm300_vm1 = vcmask 1043456   ;;  %s1035_s19 = sshll.u32 %s1322_s25, 3 }
   0xd   : > { %v1129_v4 = vand.u32 4294901760, %v298_v2  ;;  %1047 = vset.pattern.permute.xlu0 %v1070_v5  ;;  %1048 = vset.pattern.permute.xlu1 %v1070_v5  ;;  %s278_s22 = scalar_lea.vmem %s1320_s7, %s1035_s19 }
   0xe   : > { %293 = vperm.xlu0 %1047, %v290_v3   ;;  %s273_s10 = scalar_lea.vmem %s1313_s0, %s1036_s30 }
   0xf   : > { %v1133_v6 = vsub.f32 %v298_v2, %v1129_v4  ;;  %v289_v7 = vld [vmem:[%s273_s10 + $0x48] sm:$0xf]  ;;  %v288_v8 = vld [vmem:[%s273_s10 + $0x40] sm:$0xf]  ;;  %v287_v9 = vld [vmem:[%s273_s10 + $0x38] sm:$0xff] }
  0x10   : > { %v305_v11 = vsel %vm300_vm1, %v289_v7, 0  ;;  %v302_v12 = vsel %vm300_vm1, %v288_v8, 0  ;;  %v1141_v13 = vand.u32 4294901760, %v287_v9  ;;  %v286_v14 = vld [vmem:[%s273_s10 + $0x30] sm:$0xff]  ;;  %v285_v15 = vld [vmem:[%s273_s10 + $0x28] sm:$0xff]  ;;  %v284_v16 = vld [vmem:[%s273_s10 + $0x20] sm:$0xff] }
  0x11   : > { %v384_v10 = vand.u32 4294901760, %v1133_v6  ;;  %v1143_v17 = vand.u32 4294901760, %v305_v11  ;;  %v1145_v18 = vand.u32 4294901760, %v302_v12  ;;  %v1147_v19 = vand.u32 4294901760, %v286_v14  ;;  %v283_v21 = vld [vmem:[%s273_s10 + $0x18] sm:$0xff]  ;;  %v282_v22 = vld [vmem:[%s273_s10 + $0x10] sm:$0xff] }
  0x12   : > { %v1149_v20 = vand.u32 4294901760, %v285_v15  ;;  %v1151_v23 = vand.u32 4294901760, %v284_v16  ;;  %v1153_v24 = vand.u32 4294901760, %v283_v21  ;;  %v1155_v25 = vand.u32 4294901760, %v282_v22  ;;  %v281_v26 = vld [vmem:[%s273_s10 + $0x8] sm:$0xff]  ;;  %v280_v27 = vld [vmem:[%s273_s10] sm:$0xff] }
  0x13   : > { %v1158_v28 = vsub.f32 %v287_v9, %v1141_v13  ;;  %330 = vmatprep.subr.mxu0 %v1143_v17  ;;  %v1161_v29 = vand.u32 4294901760, %v281_v26  ;;  %v1164_v30 = vsub.f32 %v305_v11, %v1143_v17  ;;  %v1167_v31 = vsub.f32 %v302_v12, %v1145_v18 }
  0x14   : > { %v385_v32 = vsub.f32 %v1133_v6, %v384_v10  ;;  %332 = vmatpush1.msra.mxu0 %v1145_v18  ;;  %v1173_v33 = vand.u32 4294901760, %v280_v27  ;;  %v1177_v35 = vsub.f32 %v286_v14, %v1147_v19  ;;  %v1180_v36 = vsub.f32 %v285_v15, %v1149_v20 }
  0x15   : > { %v429_v34 = vand.u32 4294901760, %v1158_v28  ;;  %334 = vmatprep.subr.mxu0 %v1141_v13  ;;  %v417_v37 = vand.u32 4294901760, %v1164_v30  ;;  %v423_v38 = vand.u32 4294901760, %v1167_v31  ;;  %v1186_v39 = vsub.f32 %v284_v16, %v1151_v23 }
  0x16   : > { %v1189_v40 = vsub.f32 %v283_v21, %v1153_v24  ;;  %336 = vmatpush1.msra.mxu0 %v1147_v19  ;;  %v435_v42 = vand.u32 4294901760, %v1177_v35  ;;  %v441_v43 = vand.u32 4294901760, %v1180_v36  ;;  %v1198_v44 = vsub.f32 %v282_v22, %v1155_v25 }
  0x17   : > { %v430_v41 = vsub.f32 %v1158_v28, %v429_v34  ;;  %338 = vmatprep.subr.mxu0 %v1149_v20  ;;  %v418_v45 = vsub.f32 %v1164_v30, %v417_v37  ;;  %v424_v46 = vsub.f32 %v1167_v31, %v423_v38  ;;  %v447_v47 = vand.u32 4294901760, %v1186_v39 }
  0x18   : > { %v453_v48 = vand.u32 4294901760, %v1189_v40  ;;  %340 = vmatpush1.msra.mxu0 %v1151_v23  ;;  %v436_v50 = vsub.f32 %v1177_v35, %v435_v42  ;;  %v442_v51 = vsub.f32 %v1180_v36, %v441_v43  ;;  %v459_v52 = vand.u32 4294901760, %v1198_v44 }
  0x19   : > { %v431_v49 = vand.u32 4294901760, %v430_v41  ;;  %342 = vmatprep.subr.mxu0 %v1153_v24  ;;  %v419_v53 = vand.u32 4294901760, %v418_v45  ;;  %v425_v54 = vand.u32 4294901760, %v424_v46  ;;  %v448_v55 = vsub.f32 %v1186_v39, %v447_v47 }
  0x1a   : > { %v454_v56 = vsub.f32 %v1189_v40, %v453_v48  ;;  %344 = vmatpush1.msra.mxu0 %v1155_v25  ;;  %v386_v57 = vand.u32 4294901760, %v385_v32  ;;  %v437_v58 = vand.u32 4294901760, %v436_v50  ;;  %v460_v59 = vsub.f32 %v1198_v44, %v459_v52 }
  0x1b   : > { %v464_v60 = vsub.f32 %v281_v26, %v1161_v29  ;;  %346 = vmatprep.subr.mxu0 %v1161_v29  ;;  %420 = vmatprep.subr.mxu1 %v419_v53  ;;  %v443_v61 = vand.u32 4294901760, %v442_v51  ;;  %v470_v62 = vsub.f32 %v280_v27, %v1173_v33  ;;  %v449_v63 = vand.u32 4294901760, %v448_v55 }
  0x1c   : > { %348 = vmatpush1.msra.mxu0 %v1173_v33  ;;  %426 = vmatpush1.msra.mxu1 %v425_v54  ;;  %v455_v2 = vand.u32 4294901760, %v454_v56  ;;  %v461_v5 = vand.u32 4294901760, %v460_v59 }
  0x1d   : > { %v465_v0 = vand.u32 4294901760, %v464_v60  ;;  %432 = vmatprep.subr.mxu1 %v431_v49  ;;  %539 = vmatprep.subr.mxu0 %v1164_v30  ;;  %v471_v3 = vand.u32 4294901760, %v470_v62 }
  0x1e   : > { %387 = vmatmul.mubr.f32.vlgmr.msra.gmra.mxu0 %v386_v57  ;;  %438 = vmatpush1.msra.mxu1 %v437_v58 }
  0x1f   : > { %v466_v7 = vsub.f32 %v464_v60, %v465_v0  ;;  %542 = vmatpush1.msra.mxu0 %v1167_v31  ;;  %444 = vmatprep.subr.mxu1 %v443_v61  ;;  %v472_v8 = vsub.f32 %v470_v62, %v471_v3 }
  0x20   : > { %545 = vmatprep.subr.mxu0 %v1158_v28  ;;  %450 = vmatpush1.msra.mxu1 %v449_v63 }
  0x21   : > { %v467_v9 = vand.u32 4294901760, %v466_v7  ;;  %548 = vmatpush1.msra.mxu0 %v1177_v35  ;;  %456 = vmatprep.subr.mxu1 %v455_v2  ;;  %v473_v11 = vand.u32 4294901760, %v472_v8 }
  0x22   : > { %551 = vmatprep.subr.mxu0 %v1180_v36  ;;  %462 = vmatpush1.msra.mxu1 %v461_v5 }
  0x23   : > { %554 = vmatpush1.msra.mxu0 %v1186_v39  ;;  %468 = vmatprep.subr.mxu1 %v467_v9 }
  0x24   : > { %557 = vmatprep.subr.mxu0 %v1189_v40  ;;  %474 = vmatpush1.msra.mxu1 %v473_v11 }
  0x25   : > { %560 = vmatpush1.msra.mxu0 %v1198_v44  ;;  %509 = vmatmul.mubr.f32.vlgmr.msra.gmra.mxu1 %v1129_v4 }
  0x26   : > { %563 = vmatprep.subr.mxu0 %v464_v60  ;;  %631 = vmatprep.subr.mxu1 %v1143_v17 }
  0x27   : > { %566 = vmatpush1.msra.mxu0 %v470_v62  ;;  %599 = vmatprep.mubr.f32.mxu0 %v1069_v1 }
  0x28   : > { %633 = vmatpush1.msra.mxu1 %v1145_v18  ;;  %602 = vmatmul.mubr.f32.vlgmr.msra.gmra.mxu0 %v1133_v6 }
  0x29   : > { %635 = vmatprep.subr.mxu1 %v1141_v13  ;;  %717 = vmatprep.subr.mxu0 %v417_v37  ;;  %v947_v37 = vld [vmem:[%s1318_s5] sm:$0xf] }
  0x2a   : > { %637 = vmatpush1.msra.mxu1 %v1147_v19  ;;  %721 = vmatpush1.msra.mxu0 %v423_v38 }
  0x2b   : > { %639 = vmatprep.subr.mxu1 %v1149_v20  ;;  %725 = vmatprep.subr.mxu0 %v429_v34 }
  0x2c   : > { %641 = vmatpush1.msra.mxu1 %v1151_v23  ;;  %729 = vmatpush1.msra.mxu0 %v435_v42 }
  0x2d   : > { %643 = vmatprep.subr.mxu1 %v1153_v24  ;;  %733 = vmatprep.subr.mxu0 %v441_v43 }
  0x2e   : > { %645 = vmatpush1.msra.mxu1 %v1155_v25  ;;  %737 = vmatpush1.msra.mxu0 %v447_v47  ;;  %v905_v47 = vld [vmem:[%s1317_s4] sm:$0xf] }
  0x2f   : > { %647 = vmatprep.subr.mxu1 %v1161_v29  ;;  %741 = vmatprep.subr.mxu0 %v453_v48 }
  0x30   : > { %649 = vmatpush1.msra.mxu1 %v1173_v33  ;;  %682 = vmatprep.mubr.f32.mxu1 %v1069_v1 }
  0x31   : > { %745 = vmatpush1.msra.mxu0 %v459_v52  ;;  %686 = vmatmul.mubr.f32.vlgmr.msra.gmra.mxu1 %v384_v10 }
  0x32   : > { %749 = vmatprep.subr.mxu0 %v465_v0  ;;  %817 = vmatprep.subr.mxu1 %v1143_v17 }
  0x33   : > { %753 = vmatpush1.msra.mxu0 %v471_v3  ;;  %786 = vmatprep.mubr.f32.mxu0 %v1069_v1 }
  0x34   : > { %819 = vmatpush1.msra.mxu1 %v1145_v18  ;;  %788 = vmatmul.mubr.f32.vlgmr.msra.gmra.mxu0 %v1129_v4 }
  0x35   : > { %821 = vmatprep.subr.mxu1 %v1141_v13  ;;  %868 = vmatprep.mubr.f32.mxu1 %v1069_v1  ;;  %v897_v1 = vld [vmem:[%s1316_s3] sm:$0xf] }
  0x36   : > { %823 = vmatpush1.msra.mxu1 %v1147_v19  ;;  %900 = vperm.xlu1 %1048, %v897_v1  }
  0x37   : > { %825 = vmatprep.subr.mxu1 %v1149_v20 }
  0x38   : > { %827 = vmatpush1.msra.mxu1 %v1151_v23 }
  0x39   : > { %829 = vmatprep.subr.mxu1 %v1153_v24 }
  0x3a   : > { %831 = vmatpush1.msra.mxu1 %v1155_v25 }
  0x3b   : > { %833 = vmatprep.subr.mxu1 %v1161_v29 }
  0x3c   : > { %835 = vmatpush1.msra.mxu1 %v1173_v33 }
  0x3d   : > { %870 = vmatmul.mubr.f32.vlgmr.msra.gmra.mxu1 %v1129_v4 }
  0x89   : > { %v294_v10 = vpop.permute.xlu0 %293 }
  0xb1   : > { %v901_v48 = vpop.permute.xlu1 %900 }
  0xde   : > { %v388_v6 = vpop.f32.mrf.mxu0 }
  0xdf   : > { %v389_v14 = vadd.f32 %v388_v6, %v294_v10 }
  0xe0   : > { %v390_v12 = vpop.f32.mrf.mxu0 }
  0xe1   : > { %v391_v15 = vadd.f32 %v390_v12, %v294_v10 }
  0xe5   : > { %v510_v13 = vpop.f32.mrf.mxu1 }
  0xe6   : > { %v511_v18 = vadd.f32 %v510_v13, %v389_v14 }
  0xe7   : > { %v512_v16 = vpop.f32.mrf.mxu1 }
  0xe8   : > { %v603_v17 = vpop.f32.mrf.mxu0  ;;  %v513_v20 = vadd.f32 %v512_v16, %v391_v15 }
  0xe9   : > { %v604_v22 = vadd.f32 %v603_v17, %v511_v18 }
  0xea   : > { %v605_v21 = vpop.f32.mrf.mxu0 }
  0xeb   : > { %v606_v24 = vadd.f32 %v605_v21, %v513_v20 }
  0xf1   : > { %v687_v19 = vpop.f32.mrf.mxu1 }
  0xf2   : > { %v688_v25 = vadd.f32 %v687_v19, %v604_v22  ;;  %v955_v19 = vld [vmem:[%s1319_s6] sm:$0xf] }
  0xf3   : > { %v689_v23 = vpop.f32.mrf.mxu1 }
  0xf4   : > { %v789_v4 = vpop.f32.mrf.mxu0  ;;  %v690_v26 = vadd.f32 %v689_v23, %v606_v24 }
  0xf5   : > { %v790_v28 = vadd.f32 %v789_v4, %v688_v25 }
  0xf6   : > { %v791_v27 = vpop.f32.mrf.mxu0 }
  0xf7   : > { %v792_v30 = vadd.f32 %v791_v27, %v690_v26 }
  0xfd   : > { %v871_v29 = vpop.f32.mrf.mxu1 }
  0xfe   : > { %v872_v31 = vadd.f32 %v871_v29, %v790_v28 }
  0xff   : > { %v873_v32 = vpop.f32.mrf.mxu1 }
 0x100   : > { %v874_v33 = vadd.f32 %v873_v32, %v792_v30  ;;  %v876_v34 = vsel %vm300_vm1, %v872_v31, 0.0 }
 0x102   : > { %v877_v35 = vsel %vm300_vm1, %v874_v33, 0.0 }
 0x103   : > { %v878_v36 = vadd.f32 %v877_v35, %v876_v34 }
 0x105   : > { %879 = vadd.xlane.f32.xlu0 %v878_v36 }
 0x11b   : > { %950 = vperm.xlu0 %1047, %v947_v37  }
 0x18e   : > { %v880_v38 = vpop.xlane.xlu0 %879 }
 0x18f   : > { %v882_v39 = vmul.f32 0.00390625, %v880_v38 }
 0x191   : > { %v883_v40 = vsub.f32 %v872_v31, %v882_v39  ;;  %v884_v41 = vsub.f32 %v874_v33, %v882_v39 }
 0x193   : > { %v885_v42 = vmul.f32 %v883_v40, %v883_v40  ;;  %v886_v43 = vmul.f32 %v884_v41, %v884_v41 }
 0x195   : > { %v887_v44 = vsel %vm300_vm1, %v885_v42, 0.0  ;;  %v888_v45 = vsel %vm300_vm1, %v886_v43, 0.0 }
 0x196   : > { %v889_v46 = vadd.f32 %v888_v45, %v887_v44  ;;  %v951_v20 = vpop.permute.xlu0 %950 }
 0x198   : > { %890 = vadd.xlane.f32.xlu1 %v889_v46 }
 0x1a9   : > { %908 = vperm.xlu1 %1048, %v905_v47  }
 0x221   : > { %v891_v49 = vpop.xlane.xlu1 %890 }
 0x222   : > { %v892_v50 = vmul.f32 0.00390625, %v891_v49 }
 0x224   : > { %v893_v51 = vadd.f32 1e-05, %v892_v50 }
 0x225   : > { %v909_v57 = vpop.permute.xlu1 %908 }
 0x226   : > { %1049 = vrsqrt.f32 %v893_v51 }
 0x233   : > { %v1050_v52 = vpop.eup %1049 }
 0x234   : > { %v895_v53 = vmul.f32 %v1050_v52, %v883_v40  ;;  %v896_v54 = vmul.f32 %v1050_v52, %v884_v41 }
 0x236   : > { %v903_v55 = vmul.f32 %v901_v48, %v895_v53  ;;  %v904_v56 = vmul.f32 %v901_v48, %v896_v54 }
 0x238   : > { %v911_v58 = vadd.f32 %v909_v57, %v903_v55  ;;  %v912_v59 = vadd.f32 %v909_v57, %v904_v56 }
 0x23a   : > { %v1031_v60 = vmul.f32 -1.442695, %v911_v58  ;;  %v1032_v61 = vmul.f32 -1.442695, %v912_v59 }
 0x23c   : > { %1051 = vpow2.f32 %v1031_v60 }
 0x23d   : > { %1053 = vpow2.f32 %v1032_v61 }
 0x249   : > { %v1052_v62 = vpop.eup %1051 }
 0x24a   : > { %v1054_v63 = vpop.eup %1053  ;;  %v919_v0 = vadd.f32 1.0, %v1052_v62 }
 0x24b   : > { %v920_v2 = vadd.f32 1.0, %v1054_v63 }
 0x24c   : > { %1055 = vrcp.f32 %v919_v0 }
 0x24d   : > { %1057 = vrcp.f32 %v920_v2 }
 0x259   : > { %v1056_v3 = vpop.eup %1055 }
 0x25a   : > { %v1058_v5 = vpop.eup %1057  ;;  %v925_v7 = vmul.f32 %v1056_v3, %v911_v58 }
 0x25b   : > { %v926_v8 = vmul.f32 %v1058_v5, %v912_v59 }
 0x25c   : > { %v927_v9 = vsel %vm300_vm1, %v925_v7, 0.0 }
 0x25d   : > { %v928_v11 = vsel %vm300_vm1, %v926_v8, 0.0 }
 0x25e   : > { %v929_v1 = vadd.f32 %v928_v11, %v927_v9 }
 0x260   : > { %930 = vadd.xlane.f32.xlu1 %v929_v1 }
 0x2e9   : > { %v931_v6 = vpop.xlane.xlu1 %930 }
 0x2ea   : > { %v932_v10 = vmul.f32 0.00390625, %v931_v6 }
 0x2ec   : > { %v933_v12 = vsub.f32 %v925_v7, %v932_v10  ;;  %v934_v13 = vsub.f32 %v926_v8, %v932_v10 }
 0x2ee   : > { %v935_v14 = vmul.f32 %v933_v12, %v933_v12  ;;  %v936_v15 = vmul.f32 %v934_v13, %v934_v13 }
 0x2f0   : > { %v937_v16 = vsel %vm300_vm1, %v935_v14, 0.0  ;;  %v938_v17 = vsel %vm300_vm1, %v936_v15, 0.0 }
 0x2f1   : > { %v939_v18 = vadd.f32 %v938_v17, %v937_v16 }
 0x2f3   : > { %940 = vadd.xlane.f32.xlu0 %v939_v18 }
 0x309   : > { %958 = vperm.xlu0 %1047, %v955_v19  }
 0x37c   : > { %v941_v21 = vpop.xlane.xlu0 %940 }
 0x37d   : > { %v942_v22 = vmul.f32 0.00390625, %v941_v21 }
 0x37f   : > { %v943_v23 = vadd.f32 1e-05, %v942_v22 }
 0x381   : > { %1059 = vrsqrt.f32 %v943_v23 }
 0x384   : > { %v959_v28 = vpop.permute.xlu0 %958 }
 0x38e   : > { %v1060_v4 = vpop.eup %1059 }
 0x38f   : > { %v945_v24 = vmul.f32 %v1060_v4, %v933_v12  ;;  %v946_v25 = vmul.f32 %v1060_v4, %v934_v13 }
 0x391   : > { %v953_v26 = vmul.f32 %v951_v20, %v945_v24  ;;  %v954_v27 = vmul.f32 %v951_v20, %v946_v25 }
 0x393   : > { %v961_v29 = vadd.f32 %v959_v28, %v953_v26  ;;  %v962_v30 = vadd.f32 %v959_v28, %v954_v27 }
 0x395   : > { %v965_v31 = vcombine.low %v961_v29, %v962_v30 }
 0x397   : > { %967 = vst [vmem:[%s278_s22] sm:$0xff] %v965_v31 }
 0x398 PF: > { %s17_s24 = sadd.s32 1, %s1067_s24  }
 0x399   : > { %p14_p4 = scmp.ge.s32.totalorder %s17_s24, 4  }
 0x39b   :  { %16 = sbr.rel (!%p14_p4) target bundleno = 1 (0x1), region = 78 }

// kernel: f.6
= control target key start
LH: loop header
LB: loop body
LE: loop exit
PB: predicated region body
PF: predicated region fallthrough
CT: control target
= control target key end

     0   :  { %s1609_s18 = smov 0   ;;  %s2007_s0 = inlined_call_operand.vmem [shape: f32[2,36,256], index: 0, kind: input, shape index: {}]   ;;  %s2008_s1 = inlined_call_operand.vmem [shape: f32[2,36,256], index: 1, kind: input, shape index: {}]   ;;  %s2009_s2 = inlined_call_operand.vmem [shape: f32[4,36], index: 2, kind: input, shape index: {}]   ;;  %s2010_s3 = inlined_call_operand.vmem [shape: f32[8,36], index: 3, kind: input, shape index: {}]   ;;  %s2011_s4 = inlined_call_operand.vmem [shape: f32[2,4,256], index: 4, kind: output, shape index: {0}]   ;;  %s2012_s5 = inlined_call_operand.vmem [shape: f32[2,8,256], index: 5, kind: output, shape index: {1}]  }
   0x1 LB: > { %s1545_s19 = sadd.s32 4294967295, %s1576_s18   ;;  %p1549_p0 = scmp.ge.s32.totalorder %s1576_s18, 1  ;;  %s1576_s18 = sphi %s1609_s18, %s16_s18  }
   0x2   : > { %p200_p1 = scmp.lt.s32.totalorder %s1576_s18, 3 }
   0x4   : > { %p201_p2 = pnand %p1549_p0, %p200_p1 }
   0x5   : > { %p238_p3 = scmp.lt.s32.totalorder (!%p201_p2), %s1545_s19, 1 }
   0x6   : > { %204 = sbr.rel (%p201_p2) target bundleno = 295 (0x127), region = 36 }
   0xb   : > { %v258_v0 = vld [vmem:[%s2009_s2] sm:$0xf]  ;;  %vm269_vm0 = vcmask 293888   ;;  %v1578_v1 = vmov 0.0   ;;  %s2014_s19 = smov (!%p238_p3, %s1545_s19), 1  ;;  %vm273_vm1 = vcmask 1043456  }
   0xc   : > { %354 = vmatprep.mubr.f32.mxu0 %v1578_v1  ;;  %v271_v2 = vsel %vm269_vm0, %v258_v0, 0  ;;  %480 = vmatprep.mubr.f32.mxu1 %v1578_v1  ;;  %s1560_s22 = smul.u32 80, %s2014_s19  ;;  %s1558_s6 = sshll.u32 %s2014_s19, 3 }
   0xd   : > { %v1625_v3 = vand.u32 4294901760, %v271_v2  ;;  %s252_s9 = scalar_lea.vmem %s2011_s4, %s1558_s6  ;;  %s1559_s10 = sshll.u32 %s2014_s19, 4 }
   0xe   : > { %s242_s25 = scalar_lea.vmem %s2007_s0, %s1560_s22  ;;  %s1751_s28 = scalar_lea.vmem %s2008_s1, %s1560_s22 }
   0xf   : > { %v1629_v4 = vsub.f32 %v271_v2, %v1625_v3  ;;  %v268_v5 = vld [vmem:[%s242_s25 + $0x48] sm:$0xf]  ;;  %v267_v6 = vld [vmem:[%s242_s25 + $0x40] sm:$0xf]  ;;  %v266_v7 = vld [vmem:[%s242_s25 + $0x38] sm:$0xff]  ;;  %s257_s13 = scalar_lea.vmem %s2012_s5, %s1559_s10 }
  0x10   : > { %v278_v9 = vsel %vm273_vm1, %v268_v5, 0  ;;  %v275_v10 = vsel %vm273_vm1, %v267_v6, 0  ;;  %v1639_v11 = vand.u32 4294901760, %v266_v7  ;;  %v265_v12 = vld [vmem:[%s242_s25 + $0x30] sm:$0xff]  ;;  %v264_v13 = vld [vmem:[%s242_s25 + $0x28] sm:$0xff]  ;;  %v263_v14 = vld [vmem:[%s242_s25 + $0x20] sm:$0xff] }
  0x11   : > { %v357_v8 = vand.u32 4294901760, %v1629_v4  ;;  %v1641_v15 = vand.u32 4294901760, %v278_v9  ;;  %v1643_v16 = vand.u32 4294901760, %v275_v10  ;;  %v1645_v17 = vand.u32 4294901760, %v265_v12  ;;  %v262_v19 = vld [vmem:[%s242_s25 + $0x18] sm:$0xff]  ;;  %v261_v20 = vld [vmem:[%s242_s25 + $0x10] sm:$0xff] }
  0x12   : > { %v1647_v18 = vand.u32 4294901760, %v264_v13  ;;  %v1649_v21 = vand.u32 4294901760, %v263_v14  ;;  %v1651_v22 = vand.u32 4294901760, %v262_v19  ;;  %v1653_v23 = vand.u32 4294901760, %v261_v20  ;;  %v260_v24 = vld [vmem:[%s242_s25 + $0x8] sm:$0xff]  ;;  %v259_v25 = vld [vmem:[%s242_s25] sm:$0xff] }
  0x13   : > { %v1656_v26 = vsub.f32 %v266_v7, %v1639_v11  ;;  %303 = vmatprep.subr.mxu0 %v1641_v15  ;;  %v1659_v27 = vand.u32 4294901760, %v260_v24  ;;  %v1662_v28 = vsub.f32 %v278_v9, %v1641_v15  ;;  %v1665_v29 = vsub.f32 %v275_v10, %v1643_v16  ;;  %v864_v10 = vld [vmem:[%s1751_s28 + $0x48] sm:$0xf] }
  0x14   : > { %v358_v30 = vsub.f32 %v1629_v4, %v357_v8  ;;  %305 = vmatpush1.msra.mxu0 %v1643_v16  ;;  %v1671_v31 = vand.u32 4294901760, %v259_v25  ;;  %v1675_v33 = vsub.f32 %v265_v12, %v1645_v17  ;;  %v1678_v34 = vsub.f32 %v264_v13, %v1647_v18  ;;  %v863_v12 = vld [vmem:[%s1751_s28 + $0x40] sm:$0xf] }
  0x15   : > { %v402_v32 = vand.u32 4294901760, %v1656_v26  ;;  %307 = vmatprep.subr.mxu0 %v1639_v11  ;;  %v390_v35 = vand.u32 4294901760, %v1662_v28  ;;  %v396_v36 = vand.u32 4294901760, %v1665_v29  ;;  %v1684_v37 = vsub.f32 %v263_v14, %v1649_v21  ;;  %v854_v13 = vld [vmem:[%s2010_s3] sm:$0xff] }
  0x16   : > { %v1687_v38 = vsub.f32 %v262_v19, %v1651_v22  ;;  %309 = vmatpush1.msra.mxu0 %v1645_v17  ;;  %v408_v40 = vand.u32 4294901760, %v1675_v33  ;;  %v414_v41 = vand.u32 4294901760, %v1678_v34  ;;  %v1696_v42 = vsub.f32 %v261_v20, %v1653_v23  ;;  %v862_v20 = vld [vmem:[%s1751_s28 + $0x38] sm:$0xff] }
  0x17   : > { %v403_v39 = vsub.f32 %v1656_v26, %v402_v32  ;;  %311 = vmatprep.subr.mxu0 %v1647_v18  ;;  %v391_v43 = vsub.f32 %v1662_v28, %v390_v35  ;;  %v397_v44 = vsub.f32 %v1665_v29, %v396_v36  ;;  %v420_v45 = vand.u32 4294901760, %v1684_v37 }
  0x18   : > { %v426_v46 = vand.u32 4294901760, %v1687_v38  ;;  %313 = vmatpush1.msra.mxu0 %v1649_v21  ;;  %v409_v48 = vsub.f32 %v1675_v33, %v408_v40  ;;  %v415_v49 = vsub.f32 %v1678_v34, %v414_v41  ;;  %v432_v50 = vand.u32 4294901760, %v1696_v42 }
  0x19   : > { %v404_v47 = vand.u32 4294901760, %v403_v39  ;;  %315 = vmatprep.subr.mxu0 %v1651_v22  ;;  %v392_v51 = vand.u32 4294901760, %v391_v43  ;;  %v398_v52 = vand.u32 4294901760, %v397_v44  ;;  %v421_v53 = vsub.f32 %v1684_v37, %v420_v45  ;;  %v856_v43 = vld [vmem:[%s1751_s28 + $0x8] sm:$0xff] }
  0x1a   : > { %v427_v54 = vsub.f32 %v1687_v38, %v426_v46  ;;  %317 = vmatpush1.msra.mxu0 %v1653_v23  ;;  %v359_v55 = vand.u32 4294901760, %v358_v30  ;;  %v410_v56 = vand.u32 4294901760, %v409_v48  ;;  %v433_v57 = vsub.f32 %v1696_v42, %v432_v50 }
  0x1b   : > { %v1727_v58 = vsub.f32 %v260_v24, %v1659_v27  ;;  %319 = vmatprep.subr.mxu0 %v1659_v27  ;;  %393 = vmatprep.subr.mxu1 %v392_v51  ;;  %v416_v59 = vand.u32 4294901760, %v415_v49  ;;  %v1731_v60 = vsub.f32 %v259_v25, %v1671_v31  ;;  %v422_v61 = vand.u32 4294901760, %v421_v53 }
  0x1c   : > { %321 = vmatpush1.msra.mxu0 %v1671_v31  ;;  %399 = vmatpush1.msra.mxu1 %v398_v52  ;;  %v428_v63 = vand.u32 4294901760, %v427_v54  ;;  %v434_v2 = vand.u32 4294901760, %v433_v57  ;;  %v872_v14 = vsel %vm273_vm1, %v864_v10, 0  ;;  %v869_v19 = vsel %vm273_vm1, %v863_v12, 0 }
  0x1d   : > { %v438_v62 = vand.u32 4294901760, %v1727_v58  ;;  %405 = vmatprep.subr.mxu1 %v404_v47  ;;  %512 = vmatprep.subr.mxu0 %v1662_v28  ;;  %v444_v0 = vand.u32 4294901760, %v1731_v60  ;;  %v866_v24 = vsel %vm269_vm0, %v854_v13, 0  ;;  %v1779_v25 = vand.u32 4294901760, %v872_v14  ;;  %v861_v28 = vld [vmem:[%s1751_s28 + $0x30] sm:$0xff] }
  0x1e   : > { %360 = vmatmul.mubr.f32.vlgmr.msra.gmra.mxu0 %v359_v55  ;;  %411 = vmatpush1.msra.mxu1 %v410_v56  ;;  %v1784_v30 = vand.u32 4294901760, %v869_v19 }
  0x1f   : > { %v439_v5 = vsub.f32 %v1727_v58, %v438_v62  ;;  %515 = vmatpush1.msra.mxu0 %v1665_v29  ;;  %417 = vmatprep.subr.mxu1 %v416_v59  ;;  %v445_v6 = vsub.f32 %v1731_v60, %v444_v0  ;;  %v860_v29 = vld [vmem:[%s1751_s28 + $0x28] sm:$0xff]  ;;  %v1806_v39 = vsub.f32 %v872_v14, %v1779_v25 }
  0x20   : > { %518 = vmatprep.subr.mxu0 %v1656_v26  ;;  %423 = vmatpush1.msra.mxu1 %v422_v61  ;;  %v859_v26 = vld [vmem:[%s1751_s28 + $0x20] sm:$0xff] }
  0x21   : > { %v440_v7 = vand.u32 4294901760, %v439_v5  ;;  %521 = vmatpush1.msra.mxu0 %v1675_v33  ;;  %429 = vmatprep.subr.mxu1 %v428_v63  ;;  %v446_v9 = vand.u32 4294901760, %v445_v6  ;;  %v858_v33 = vld [vmem:[%s1751_s28 + $0x18] sm:$0xff] }
  0x22   : > { %524 = vmatprep.subr.mxu0 %v1678_v34  ;;  %435 = vmatpush1.msra.mxu1 %v434_v2  ;;  %v1812_v34 = vsub.f32 %v869_v19, %v1784_v30 }
  0x23   : > { %527 = vmatpush1.msra.mxu0 %v1684_v37  ;;  %441 = vmatprep.subr.mxu1 %v440_v7  ;;  %v1819_v37 = vand.u32 4294901760, %v859_v26 }
  0x24   : > { %530 = vmatprep.subr.mxu0 %v1687_v38  ;;  %447 = vmatpush1.msra.mxu1 %v446_v9  ;;  %v1829_v38 = vand.u32 4294901760, %v858_v33 }
  0x25   : > { %533 = vmatpush1.msra.mxu0 %v1696_v42  ;;  %482 = vmatmul.mubr.f32.vlgmr.msra.gmra.mxu1 %v1625_v3  ;;  %v984_v42 = vand.u32 4294901760, %v1806_v39 }
  0x26   : > { %536 = vmatprep.subr.mxu0 %v1727_v58  ;;  %604 = vmatprep.subr.mxu1 %v1641_v15  ;;  %v1865_v53 = vsub.f32 %v858_v33, %v1829_v38 }
  0x27   : > { %539 = vmatpush1.msra.mxu0 %v1731_v60  ;;  %572 = vmatprep.mubr.f32.mxu0 %v1578_v1  ;;  %v985_v54 = vsub.f32 %v1806_v39, %v984_v42 }
  0x28   : > { %606 = vmatpush1.msra.mxu1 %v1643_v16  ;;  %575 = vmatmul.mubr.f32.vlgmr.msra.gmra.mxu0 %v1629_v4  ;;  %v1847_v4 = vand.u32 4294901760, %v856_v43 }
  0x29   : > { %608 = vmatprep.subr.mxu1 %v1639_v11  ;;  %690 = vmatprep.subr.mxu0 %v390_v35  ;;  %v1790_v35 = vand.u32 4294901760, %v862_v20  ;;  %v986_v60 = vand.u32 4294901760, %v985_v54 }
  0x2a   : > { %610 = vmatpush1.msra.mxu1 %v1645_v17  ;;  %694 = vmatpush1.msra.mxu0 %v396_v36  ;;  %v1793_v36 = vand.u32 4294901760, %v866_v24  ;;  %v1883_v56 = vsub.f32 %v856_v43, %v1847_v4 }
  0x2b   : > { %612 = vmatprep.subr.mxu1 %v1647_v18  ;;  %698 = vmatprep.subr.mxu0 %v402_v32  ;;  %v1802_v32 = vand.u32 4294901760, %v861_v28  ;;  %v1823_v44 = vsub.f32 %v862_v20, %v1790_v35 }
  0x2c   : > { %614 = vmatpush1.msra.mxu1 %v1649_v21  ;;  %702 = vmatpush1.msra.mxu0 %v408_v40  ;;  %v1814_v40 = vand.u32 4294901760, %v860_v29 }
  0x2d   : > { %616 = vmatprep.subr.mxu1 %v1651_v22  ;;  %706 = vmatprep.subr.mxu0 %v414_v41  ;;  %v857_v41 = vld [vmem:[%s1751_s28 + $0x10] sm:$0xff]  ;;  %v1839_v47 = vsub.f32 %v861_v28, %v1802_v32  ;;  %v996_v51 = vand.u32 4294901760, %v1823_v44 }
  0x2e   : > { %618 = vmatpush1.msra.mxu1 %v1653_v23  ;;  %710 = vmatpush1.msra.mxu0 %v420_v45  ;;  %v855_v45 = vld [vmem:[%s1751_s28] sm:$0xff]  ;;  %v1841_v48 = vand.u32 4294901760, %v857_v41  ;;  %v1851_v49 = vsub.f32 %v860_v29, %v1814_v40 }
  0x2f   : > { %620 = vmatprep.subr.mxu1 %v1659_v27  ;;  %714 = vmatprep.subr.mxu0 %v426_v46  ;;  %v1833_v46 = vsub.f32 %v866_v24, %v1793_v36 }
  0x30   : > { %622 = vmatpush1.msra.mxu1 %v1671_v31  ;;  %655 = vmatprep.mubr.f32.mxu1 %v1578_v1 }
  0x31   : > { %718 = vmatpush1.msra.mxu0 %v432_v50  ;;  %659 = vmatmul.mubr.f32.vlgmr.msra.gmra.mxu1 %v357_v8  ;;  %v990_v8 = vand.u32 4294901760, %v1812_v34  ;;  %v1858_v50 = vand.u32 4294901760, %v855_v45  ;;  %v951_v52 = vand.u32 4294901760, %v1833_v46 }
  0x32   : > { %722 = vmatprep.subr.mxu0 %v438_v62  ;;  %790 = vmatprep.subr.mxu1 %v1641_v15  ;;  %v1856_v15 = vsub.f32 %v859_v26, %v1819_v37 }
  0x33   : > { %726 = vmatpush1.msra.mxu0 %v444_v0  ;;  %759 = vmatprep.mubr.f32.mxu0 %v1578_v1  ;;  %v991_v55 = vsub.f32 %v1812_v34, %v990_v8  ;;  %v1888_v57 = vsub.f32 %v855_v45, %v1858_v50  ;;  %v952_v59 = vsub.f32 %v1833_v46, %v951_v52 }
  0x34   : > { %792 = vmatpush1.msra.mxu1 %v1643_v16  ;;  %761 = vmatmul.mubr.f32.vlgmr.msra.gmra.mxu0 %v1625_v3  ;;  %v1870_v16 = vsub.f32 %v857_v41, %v1841_v48  ;;  %v1014_v58 = vand.u32 4294901760, %v1856_v15 }
  0x35   : > { %794 = vmatprep.subr.mxu1 %v1639_v11  ;;  %897 = vmatprep.subr.mxu0 %v1779_v25  ;;  %v1002_v11 = vand.u32 4294901760, %v1839_v47  ;;  %v953_v5 = vand.u32 4294901760, %v952_v59 }
  0x36   : > { %796 = vmatpush1.msra.mxu1 %v1645_v17  ;;  %899 = vmatpush1.msra.mxu0 %v1784_v30  ;;  %v1008_v17 = vand.u32 4294901760, %v1851_v49  ;;  %v1026_v62 = vand.u32 4294901760, %v1870_v16  ;;  %v1015_v2 = vsub.f32 %v1856_v15, %v1014_v58 }
  0x37   : > { %798 = vmatprep.subr.mxu1 %v1647_v18  ;;  %901 = vmatprep.subr.mxu0 %v1790_v35  ;;  %v997_v18 = vsub.f32 %v1823_v44, %v996_v51  ;;  %v1003_v61 = vsub.f32 %v1839_v47, %v1002_v11 }
  0x38   : > { %800 = vmatpush1.msra.mxu1 %v1649_v21  ;;  %903 = vmatpush1.msra.mxu0 %v1802_v32  ;;  %v1020_v21 = vand.u32 4294901760, %v1865_v53  ;;  %v1009_v63 = vsub.f32 %v1851_v49, %v1008_v17  ;;  %v1027_v7 = vsub.f32 %v1870_v16, %v1026_v62  ;;  %v1016_v10 = vand.u32 4294901760, %v1015_v2 }
  0x39   : > { %802 = vmatprep.subr.mxu1 %v1651_v22  ;;  %905 = vmatprep.subr.mxu0 %v1814_v40  ;;  %v992_v22 = vand.u32 4294901760, %v991_v55  ;;  %v998_v0 = vand.u32 4294901760, %v997_v18 }
  0x3a   : > { %804 = vmatpush1.msra.mxu1 %v1653_v23  ;;  %907 = vmatpush1.msra.mxu0 %v1819_v37  ;;  %v1032_v23 = vand.u32 4294901760, %v1883_v56  ;;  %v1021_v6 = vsub.f32 %v1865_v53, %v1020_v21  ;;  %v1010_v9 = vand.u32 4294901760, %v1009_v63  ;;  %v1028_v14 = vand.u32 4294901760, %v1027_v7 }
  0x3b   : > { %806 = vmatprep.subr.mxu1 %v1659_v27  ;;  %909 = vmatprep.subr.mxu0 %v1829_v38  ;;  %v1038_v27 = vand.u32 4294901760, %v1888_v57 }
  0x3c   : > { %808 = vmatpush1.msra.mxu1 %v1671_v31  ;;  %841 = vmatprep.mubr.f32.mxu1 %v1578_v1  ;;  %v1004_v31 = vand.u32 4294901760, %v1003_v61  ;;  %v1022_v13 = vand.u32 4294901760, %v1021_v6 }
  0x3d   : > { %911 = vmatpush1.msra.mxu0 %v1841_v48  ;;  %843 = vmatmul.mubr.f32.vlgmr.msra.gmra.mxu1 %v1625_v3  ;;  %v1033_v3 = vsub.f32 %v1883_v56, %v1032_v23  ;;  %v1039_v12 = vsub.f32 %v1888_v57, %v1038_v27 }
  0x3e   : > { %913 = vmatprep.subr.mxu0 %v1847_v4  ;;  %987 = vmatprep.subr.mxu1 %v986_v60 }
  0x3f   : > { %915 = vmatpush1.msra.mxu0 %v1858_v50  ;;  %993 = vmatpush1.msra.mxu1 %v992_v22  ;;  %v1034_v19 = vand.u32 4294901760, %v1033_v3  ;;  %v1040_v20 = vand.u32 4294901760, %v1039_v12 }
  0x40   : > { %948 = vmatprep.mubr.f32.mxu0 %v1578_v1  ;;  %999 = vmatprep.subr.mxu1 %v998_v0 }
  0x41   : > { %1106 = vmatprep.subr.mxu0 %v1806_v39  ;;  %954 = vmatmul.mubr.f32.vlgmr.msra.gmra.mxu0 %v953_v5 }
  0x42   : > { %1005 = vmatpush1.msra.mxu1 %v1004_v31  ;;  %1109 = vmatpush1.msra.mxu0 %v1812_v34 }
  0x43   : > { %1011 = vmatprep.subr.mxu1 %v1010_v9  ;;  %1112 = vmatprep.subr.mxu0 %v1823_v44 }
  0x44   : > { %1017 = vmatpush1.msra.mxu1 %v1016_v10  ;;  %1115 = vmatpush1.msra.mxu0 %v1839_v47 }
  0x45   : > { %1023 = vmatprep.subr.mxu1 %v1022_v13  ;;  %1118 = vmatprep.subr.mxu0 %v1851_v49 }
  0x46   : > { %1029 = vmatpush1.msra.mxu1 %v1028_v14  ;;  %1121 = vmatpush1.msra.mxu0 %v1856_v15 }
  0x47   : > { %1035 = vmatprep.subr.mxu1 %v1034_v19  ;;  %1124 = vmatprep.subr.mxu0 %v1865_v53 }
  0x48   : > { %1041 = vmatpush1.msra.mxu1 %v1040_v20  ;;  %1074 = vmatprep.mubr.f32.mxu1 %v1578_v1 }
  0x49   : > { %1127 = vmatpush1.msra.mxu0 %v1870_v16  ;;  %1076 = vmatmul.mubr.f32.vlgmr.msra.gmra.mxu1 %v1793_v36 }
  0x4a   : > { %1130 = vmatprep.subr.mxu0 %v1883_v56  ;;  %1198 = vmatprep.subr.mxu1 %v1779_v25 }
  0x4b   : > { %1133 = vmatpush1.msra.mxu0 %v1888_v57  ;;  %1166 = vmatprep.mubr.f32.mxu0 %v1578_v1 }
  0x4c   : > { %1200 = vmatpush1.msra.mxu1 %v1784_v30  ;;  %1169 = vmatmul.mubr.f32.vlgmr.msra.gmra.mxu0 %v1833_v46 }
  0x4d   : > { %1202 = vmatprep.subr.mxu1 %v1790_v35  ;;  %1284 = vmatprep.subr.mxu0 %v984_v42 }
  0x4e   : > { %1204 = vmatpush1.msra.mxu1 %v1802_v32  ;;  %1288 = vmatpush1.msra.mxu0 %v990_v8 }
  0x4f   : > { %1206 = vmatprep.subr.mxu1 %v1814_v40  ;;  %1292 = vmatprep.subr.mxu0 %v996_v51 }
  0x50   : > { %1208 = vmatpush1.msra.mxu1 %v1819_v37  ;;  %1296 = vmatpush1.msra.mxu0 %v1002_v11 }
  0x51   : > { %1210 = vmatprep.subr.mxu1 %v1829_v38  ;;  %1300 = vmatprep.subr.mxu0 %v1008_v17 }
  0x52   : > { %1212 = vmatpush1.msra.mxu1 %v1841_v48  ;;  %1304 = vmatpush1.msra.mxu0 %v1014_v58 }
  0x53   : > { %1214 = vmatprep.subr.mxu1 %v1847_v4  ;;  %1308 = vmatprep.subr.mxu0 %v1020_v21 }
  0x54   : > { %1216 = vmatpush1.msra.mxu1 %v1858_v50  ;;  %1249 = vmatprep.mubr.f32.mxu1 %v1578_v1 }
  0x55   : > { %1312 = vmatpush1.msra.mxu0 %v1026_v62  ;;  %1253 = vmatmul.mubr.f32.vlgmr.msra.gmra.mxu1 %v951_v52 }
  0x56   : > { %1316 = vmatprep.subr.mxu0 %v1032_v23  ;;  %1384 = vmatprep.subr.mxu1 %v1779_v25 }
  0x57   : > { %1320 = vmatpush1.msra.mxu0 %v1038_v27  ;;  %1353 = vmatprep.mubr.f32.mxu0 %v1578_v1 }
  0x58   : > { %1386 = vmatpush1.msra.mxu1 %v1784_v30  ;;  %1355 = vmatmul.mubr.f32.vlgmr.msra.gmra.mxu0 %v1793_v36 }
  0x59   : > { %1388 = vmatprep.subr.mxu1 %v1790_v35  ;;  %1435 = vmatprep.mubr.f32.mxu1 %v1578_v1 }
  0x5a   : > { %1390 = vmatpush1.msra.mxu1 %v1802_v32 }
  0x5b   : > { %1392 = vmatprep.subr.mxu1 %v1814_v40 }
  0x5c   : > { %1394 = vmatpush1.msra.mxu1 %v1819_v37 }
  0x5d   : > { %1396 = vmatprep.subr.mxu1 %v1829_v38 }
  0x5e   : > { %1398 = vmatpush1.msra.mxu1 %v1841_v48 }
  0x5f   : > { %1400 = vmatprep.subr.mxu1 %v1847_v4 }
  0x60   : > { %1402 = vmatpush1.msra.mxu1 %v1858_v50 }
  0x61   : > { %1437 = vmatmul.mubr.f32.vlgmr.msra.gmra.mxu1 %v1793_v36 }
  0xde   : > { %v361_v24 = vpop.f32.mrf.mxu0 }
  0xe0   : > { %v363_v25 = vpop.f32.mrf.mxu0 }
  0xe5   : > { %v483_v30 = vpop.f32.mrf.mxu1 }
  0xe6   : > { %v484_v29 = vadd.f32 %v483_v30, %v361_v24 }
  0xe7   : > { %v485_v1 = vpop.f32.mrf.mxu1 }
  0xe8   : > { %v576_v28 = vpop.f32.mrf.mxu0  ;;  %v486_v26 = vadd.f32 %v485_v1, %v363_v25 }
  0xe9   : > { %v577_v34 = vadd.f32 %v576_v28, %v484_v29 }
  0xea   : > { %v578_v32 = vpop.f32.mrf.mxu0 }
  0xeb   : > { %v579_v40 = vadd.f32 %v578_v32, %v486_v26 }
  0xf1   : > { %v660_v35 = vpop.f32.mrf.mxu1 }
  0xf2   : > { %v661_v41 = vadd.f32 %v660_v35, %v577_v34 }
  0xf3   : > { %v662_v33 = vpop.f32.mrf.mxu1 }
  0xf4   : > { %v762_v39 = vpop.f32.mrf.mxu0  ;;  %v663_v37 = vadd.f32 %v662_v33, %v579_v40 }
  0xf5   : > { %v763_v38 = vadd.f32 %v762_v39, %v661_v41 }
  0xf6   : > { %v764_v43 = vpop.f32.mrf.mxu0 }
  0xf7   : > { %v765_v36 = vadd.f32 %v764_v43, %v663_v37 }
  0xfd   : > { %v844_v44 = vpop.f32.mrf.mxu1 }
  0xfe   : > { %v845_v46 = vadd.f32 %v844_v44, %v763_v38 }
  0xff   : > { %v846_v45 = vpop.f32.mrf.mxu1 }
 0x100   : > { %v847_v47 = vadd.f32 %v846_v45, %v765_v36 }
 0x101   : > { %v955_v42 = vpop.f32.mrf.mxu0 }
 0x102   : > { %v851_v48 = vcombine.low %v845_v46, %v847_v47 }
 0x103   : > { %v957_v4 = vpop.f32.mrf.mxu0 }
 0x104   : > { %853 = vst [vmem:[%s252_s9] sm:$0xff] %v851_v48 }
 0x109   : > { %v1077_v8 = vpop.f32.mrf.mxu1 }
 0x10a   : > { %v1078_v50 = vadd.f32 %v1077_v8, %v955_v42 }
 0x10b   : > { %v1079_v49 = vpop.f32.mrf.mxu1 }
 0x10c   : > { %v1170_v15 = vpop.f32.mrf.mxu0  ;;  %v1080_v52 = vadd.f32 %v1079_v49, %v957_v4 }
 0x10d   : > { %v1171_v16 = vadd.f32 %v1170_v15, %v1078_v50 }
 0x10e   : > { %v1172_v53 = vpop.f32.mrf.mxu0 }
 0x10f   : > { %v1173_v55 = vadd.f32 %v1172_v53, %v1080_v52 }
 0x115   : > { %v1254_v51 = vpop.f32.mrf.mxu1 }
 0x116   : > { %v1255_v17 = vadd.f32 %v1254_v51, %v1171_v16 }
 0x117   : > { %v1256_v54 = vpop.f32.mrf.mxu1 }
 0x118   : > { %v1356_v11 = vpop.f32.mrf.mxu0  ;;  %v1257_v56 = vadd.f32 %v1256_v54, %v1173_v55 }
 0x119   : > { %v1357_v18 = vadd.f32 %v1356_v11, %v1255_v17 }
 0x11a   : > { %v1358_v57 = vpop.f32.mrf.mxu0 }
 0x11b   : > { %v1359_v59 = vadd.f32 %v1358_v57, %v1257_v56 }
 0x121   : > { %v1438_v58 = vpop.f32.mrf.mxu1 }
 0x122   : > { %v1439_v21 = vadd.f32 %v1438_v58, %v1357_v18 }
 0x123   : > { %v1440_v60 = vpop.f32.mrf.mxu1 }
 0x124   : > { %1443 = vst [vmem:[%s257_s13] sm:$0xff] %v1439_v21  ;;  %v1441_v61 = vadd.f32 %v1440_v60, %v1359_v59 }
 0x126   : > { %1444 = vst [vmem:[%s257_s13 + $0x8] sm:$0xff] %v1441_v61 }
 0x127 PF: > { %s16_s18 = sadd.s32 1, %s1576_s18  }
 0x128   : > { %p13_p4 = scmp.ge.s32.totalorder %s16_s18, 4  }
 0x12a   :  { %15 = sbr.rel (!%p13_p4) target bundleno = 1 (0x1), region = 81 }

// kernel: f.7
= control target key start
LH: loop header
LB: loop body
LE: loop exit
PB: predicated region body
PF: predicated region fallthrough
CT: control target
= control target key end

     0   :  { %s2752_s24 = smov 0   ;;  %s2886_s0 = inlined_call_operand.vmem [shape: f32[2,2,2,256], index: 0, kind: input, shape index: {}]   ;;  %s2887_s1 = inlined_call_operand.vmem [shape: f32[2,2,2,256], index: 1, kind: input, shape index: {}]   ;;  %s2888_s2 = inlined_call_operand.vmem [shape: f32[2,2,2,256], index: 2, kind: input, shape index: {}]   ;;  %s2889_s3 = inlined_call_operand.vmem [shape: f32[2,2,2,256], index: 3, kind: input, shape index: {}]   ;;  %s2890_s4 = inlined_call_operand.vmem [shape: f32[2,2,1], index: 4, kind: input, shape index: {}]   ;;  %s2891_s5 = inlined_call_operand.vmem [shape: f32[2,2,1], index: 5, kind: input, shape index: {}]   ;;  %s2892_s6 = inlined_call_operand.vmem [shape: f32[2,1,1], index: 6, kind: input, shape index: {}]   ;;  %s2893_s7 = inlined_call_operand.vmem [shape: f32[2,2,2,256], index: 7, kind: output, shape index: {}]  }
   0x1 LB: > { %s2647_s25 = sadd.s32 4294967295, %s2706_s24   ;;  %p2651_p0 = scmp.ge.s32.totalorder %s2706_s24, 1  ;;  %s2706_s24 = sphi %s2752_s24, %s17_s24  }
   0x2   : > { %p275_p1 = scmp.lt.s32.totalorder %s2706_s24, 3 }
   0x4   : > { %p276_p2 = pnand %p2651_p0, %p275_p1 }
   0x5   : > { %p325_p3 = scmp.lt.s32.totalorder (!%p276_p2), %s2647_s25, 1 }
   0x6   : > { %279 = sbr.rel (%p276_p2) target bundleno = 1113 (0x459), region = 48 }
   0xb   : > { %v365_v0 = vlaneseq  ;;  %v2708_v1 = vmov 1983009808   ;;  %s2895_s25 = smov (!%p325_p3, %s2647_s25), 1  ;;  %vm1349_vm0 = vcmask 9216   ;;  %vm1385_vm1 = vcmask 1041408  }
   0xc   : > { %v363_v2 = vunpack.c.l.s4 %v2708_v1  ;;  %s2765_s26 = sshll.u32 %s2895_s25, 3  ;;  %vm1381_vm2 = vcmask 15360  }
   0xd   : > { %v2762_v3 = vshrl.u32 %v365_v0, 7  ;;  %s339_s29 = scalar_lea.vmem %s2888_s2, %s2765_s26  ;;  %s334_s9 = scalar_lea.vmem %s2887_s1, %s2765_s26 }
   0xe   : > { %v364_v4 = vunpack.c.0.s8 %v363_v2  ;;  %v2662_v6 = vld.sshfl [vmem:[%s339_s29] sm:$0x33 pattern:$0x76325410]  ;;  %v354_v10 = vld [vmem:[%s334_s9 + $0x4] sm:$0xf]  ;;  %s344_s12 = scalar_lea.vmem %s2889_s3, %s2765_s26  ;;  %s329_s15 = scalar_lea.vmem %s2886_s0, %s2765_s26 }
   0xf   : > { %v353_v7 = vld [vmem:[%s334_s9] sm:$0xf]  ;;  %v380_v8 = vcombine.high %v2662_v6, %v2662_v6  ;;  %v415_v9 = vand.u32 4294901760, %v2662_v6  ;;  %v356_v12 = vmul.f32 0.0625, %v354_v10  ;;  %s352_s8 = scalar_lea.vmem %s2893_s7, %s2765_s26 }
  0x10   : > { %v2776_v5 = vsub.s32 %v364_v4, %v2762_v3  ;;  %v355_v11 = vmul.f32 0.0625, %v353_v7  ;;  %v2663_v13 = vld.sshfl [vmem:[%s339_s29 + $0x4] sm:$0x33 pattern:$0x76325410]  ;;  %s347_s29 = scalar_lea.vmem %s2892_s6, %s2895_s25 }
  0x11   : > { %v413_v14 = vand.u32 4294901760, %v380_v8  ;;  %v502_v15 = vsub.f32 %v2662_v6, %v415_v9  ;;  %v874_v17 = vcombine.high %v2663_v13, %v2663_v13  ;;  %v2782_v24 = vand.u32 4294901760, %v2663_v13 }
  0x12   : > { %v368_v16 = vrot.slane %v355_v11, %v2776_v5  ;;  %v862_v18 = vrot.slane %v356_v12, %v2776_v5 }
  0x13   : > { %414 = vmatprep.subr.mxu0 %v413_v14  ;;  %v496_v19 = vsub.f32 %v380_v8, %v413_v14  ;;  %v503_v20 = vand.u32 4294901760, %v502_v15  ;;  %v2780_v23 = vand.u32 4294901760, %v874_v17  ;;  %v996_v36 = vsub.f32 %v2663_v13, %v2782_v24 }
  0x14   : > { %v369_v21 = vcombine.high %v368_v16, %v368_v16  ;;  %v455_v22 = vand.u32 4294901760, %v368_v16  ;;  %416 = vmatpush1.xpose.msra.mxu0 %v415_v9  ;;  %v863_v25 = vcombine.high %v862_v18, %v862_v18  ;;  %v2788_v37 = vand.u32 4294901760, %v862_v18 }
  0x15   : > { %v497_v26 = vand.u32 4294901760, %v496_v19  ;;  %v504_v27 = vsub.f32 %v502_v15, %v503_v20  ;;  %579 = vmatprep.subr.mxu0 %v496_v19  ;;  %v990_v34 = vsub.f32 %v874_v17, %v2780_v23  ;;  %v997_v45 = vand.u32 4294901760, %v996_v36 }
  0x16   : > { %v449_v28 = vand.u32 4294901760, %v369_v21  ;;  %v456_v29 = vsub.f32 %v368_v16, %v455_v22  ;;  %v2784_v30 = vand.u32 4294901760, %v863_v25  ;;  %v950_v46 = vsub.f32 %v862_v18, %v2788_v37 }
  0x17   : > { %v498_v31 = vsub.f32 %v496_v19, %v497_v26  ;;  %v505_v35 = vand.u32 4294901760, %v504_v27  ;;  %v991_v43 = vand.u32 4294901760, %v990_v34  ;;  %v998_v50 = vsub.f32 %v996_v36, %v997_v45 }
  0x18   : > { %v450_v32 = vsub.f32 %v369_v21, %v449_v28  ;;  %540 = vmatprep.mubr.f32.mxu1 %v449_v28  ;;  %v457_v33 = vand.u32 4294901760, %v456_v29  ;;  %v944_v41 = vsub.f32 %v863_v25, %v2784_v30  ;;  %v951_v51 = vand.u32 4294901760, %v950_v46 }
  0x19   : > { %v499_v38 = vand.u32 4294901760, %v498_v31  ;;  %v992_v49 = vsub.f32 %v990_v34, %v991_v43  ;;  %v999_v54 = vand.u32 4294901760, %v998_v50 }
  0x1a   : > { %v451_v39 = vand.u32 4294901760, %v450_v32  ;;  %v458_v40 = vsub.f32 %v456_v29, %v457_v33  ;;  %v945_v48 = vand.u32 4294901760, %v944_v41  ;;  %v952_v55 = vsub.f32 %v950_v46, %v951_v51 }
  0x1b   : > { %500 = vmatprep.subr.mxu1 %v499_v38  ;;  %v993_v53 = vand.u32 4294901760, %v992_v49 }
  0x1c   : > { %v452_v42 = vsub.f32 %v450_v32, %v451_v39  ;;  %506 = vmatpush1.xpose.msra.mxu1 %v505_v35  ;;  %v459_v44 = vand.u32 4294901760, %v458_v40  ;;  %v946_v52 = vsub.f32 %v944_v41, %v945_v48  ;;  %v953_v57 = vand.u32 4294901760, %v952_v55 }
  0x1d   : > { %656 = vmatprep.subr.mxu1 %v413_v14 }
  0x1e   : > { %v453_v47 = vand.u32 4294901760, %v452_v42  ;;  %v947_v56 = vand.u32 4294901760, %v946_v52  ;;  %v2664_v42 = vld.sshfl [vmem:[%s344_s12] sm:$0x33 pattern:$0x76325410] }
  0x1f   : > { %542 = vmatmul.mubr.f32.vlgmr.msra.gmra.mxu1 %v455_v22 }
  0x20   : > { %454 = vmatprep.mubr.f32.mxu0 %v453_v47  ;;  %658 = vmatpush1.xpose.msra.mxu1 %v415_v9 }
  0x21   : > { %460 = vmatmul.mubr.f32.vlgmr.msra.gmra.mxu0 %v459_v44  ;;  %694 = vmatprep.mubr.f32.mxu1 %v451_v39 }
  0x22   : > { %582 = vmatpush1.xpose.msra.mxu0 %v502_v15  ;;  %617 = vmatprep.mubr.f32.mxu0 %v450_v32 }
  0x23   : > { %736 = vmatprep.subr.mxu0 %v497_v26  ;;  %698 = vmatmul.mubr.f32.vlgmr.msra.gmra.mxu1 %v457_v33 }
  0x24   : > { %812 = vmatprep.subr.mxu1 %v413_v14  ;;  %848 = vmatprep.mubr.f32.mxu1 %v449_v28 }
  0x25   : > { %620 = vmatmul.mubr.f32.vlgmr.msra.gmra.mxu0 %v456_v29  ;;  %814 = vmatpush1.xpose.msra.mxu1 %v415_v9 }
  0x26   : > { %740 = vmatpush1.xpose.msra.mxu0 %v503_v20  ;;  %774 = vmatprep.mubr.f32.mxu0 %v449_v28 }
  0x27   : > { %908 = vmatprep.subr.mxu0 %v2780_v23  ;;  %994 = vmatprep.subr.mxu1 %v993_v53  ;;  %v2709_v53 = vmov 0.0  }
  0x28   : > { %850 = vmatmul.mubr.f32.vlgmr.msra.gmra.mxu1 %v455_v22 }
  0x29   : > { %776 = vmatmul.mubr.f32.vlgmr.msra.gmra.mxu0 %v455_v22  ;;  %1000 = vmatpush1.xpose.msra.mxu1 %v999_v54 }
  0x2a   : > { %910 = vmatpush1.xpose.msra.mxu0 %v2782_v24  ;;  %948 = vmatprep.mubr.f32.mxu0 %v947_v56 }
  0x2b   : > { %1034 = vmatprep.mubr.f32.mxu1 %v2784_v30  ;;  %1073 = vmatprep.subr.mxu0 %v990_v34 }
  0x2c   : > { %1036 = vmatmul.mubr.f32.vlgmr.msra.gmra.mxu1 %v2788_v37  ;;  %1150 = vmatprep.subr.mxu1 %v2780_v23 }
  0x2d   : > { %954 = vmatmul.mubr.f32.vlgmr.msra.gmra.mxu0 %v953_v57  ;;  %1152 = vmatpush1.xpose.msra.mxu1 %v2782_v24  ;;  %v2665_v57 = vld.sshfl [vmem:[%s344_s12 + $0x4] sm:$0x33 pattern:$0x76325410] }
  0x2e   : > { %1076 = vmatpush1.xpose.msra.mxu0 %v996_v36  ;;  %1111 = vmatprep.mubr.f32.mxu0 %v944_v41 }
  0x2f   : > { %1188 = vmatprep.mubr.f32.mxu1 %v945_v48  ;;  %1230 = vmatprep.subr.mxu0 %v991_v43  ;;  %v1380_v43 = vcombine.high %v2664_v42, %v2664_v42 }
  0x30   : > { %1192 = vmatmul.mubr.f32.vlgmr.msra.gmra.mxu1 %v951_v51  ;;  %1306 = vmatprep.subr.mxu1 %v2780_v23 }
  0x31   : > { %1114 = vmatmul.mubr.f32.vlgmr.msra.gmra.mxu0 %v950_v46  ;;  %1308 = vmatpush1.xpose.msra.mxu1 %v2782_v24  ;;  %v1388_v44 = vsel %vm1385_vm1, %v1380_v43, 0  ;;  %v1386_v46 = vsel %vm1385_vm1, %v2664_v42, 0 }
  0x32   : > { %1234 = vmatpush1.xpose.msra.mxu0 %v997_v45  ;;  %1268 = vmatprep.mubr.f32.mxu0 %v2784_v30  ;;  %v1420_v45 = vand.u32 4294901760, %v1388_v44  ;;  %v1422_v47 = vand.u32 4294901760, %v1386_v46 }
  0x33   : > { %1342 = vmatprep.mubr.f32.mxu1 %v2784_v30 }
  0x34   : > { %1344 = vmatmul.mubr.f32.vlgmr.msra.gmra.mxu1 %v2788_v37  ;;  %v1499_v48 = vsub.f32 %v1388_v44, %v1420_v45  ;;  %1421 = vmatprep.subr.mxu0 %v1420_v45  ;;  %v2817_v49 = vsub.f32 %v1386_v46, %v1422_v47 }
  0x35   : > { %1270 = vmatmul.mubr.f32.vlgmr.msra.gmra.mxu0 %v2788_v37  ;;  %1542 = vmatprep.mubr.f32.mxu1 %v2709_v53 }
  0x36   : > { %1423 = vmatpush1.msra.mxu0 %v1422_v47  ;;  %v1500_v50 = vand.u32 4294901760, %v1499_v48  ;;  %v1506_v51 = vand.u32 4294901760, %v2817_v49  ;;  %1456 = vmatprep.mubr.f32.mxu0 %v2709_v53 }
  0x37   : > { %1582 = vmatprep.subr.mxu0 %v1499_v48 }
  0x38   : > { %v1501_v52 = vsub.f32 %v1499_v48, %v1500_v50  ;;  %v1507_v54 = vsub.f32 %v2817_v49, %v1506_v51 }
  0x3a   : > { %v1502_v55 = vand.u32 4294901760, %v1501_v52  ;;  %v1508_v56 = vand.u32 4294901760, %v1507_v54 }
  0x3c   : > { %1503 = vmatprep.subr.mxu1 %v1502_v55 }
  0x3d   : > { %1509 = vmatpush1.msra.mxu1 %v1508_v56 }
  0x3e   : > { %1658 = vmatprep.subr.mxu1 %v1420_v45 }
  0xdf   : > { %v543_v58 = vpop.f32.mrf.mxu1 }
  0xe1   : > { %v461_v59 = vpop.f32.mrf.mxu0  ;;  %v545_v60 = vpop.f32.mrf.mxu1 }
  0xe2   : > { %v544_v62 = vadd.f32 %v543_v58, %v461_v59  ;;  %v1863_v58 = vcombine.high %v2665_v57, %v2665_v57 }
  0xe3   : > { %v463_v61 = vpop.f32.mrf.mxu0  ;;  %v699_v63 = vpop.f32.mrf.mxu1 }
  0xe4   : > { %v1869_v60 = vsel %vm1385_vm1, %v1863_v58, 0 }
  0xe5   : > { %v621_v0 = vpop.f32.mrf.mxu0  ;;  %v701_v2 = vpop.f32.mrf.mxu1  ;;  %v1901_v61 = vand.u32 4294901760, %v1869_v60 }
  0xe6   : > { %v622_v1 = vadd.f32 %v621_v0, %v544_v62  ;;  %v1867_v62 = vsel %vm1385_vm1, %v2665_v57, 0 }
  0xe7   : > { %v623_v4 = vpop.f32.mrf.mxu0  ;;  %v1903_v0 = vand.u32 4294901760, %v1867_v62 }
  0xe8   : > { %v700_v6 = vadd.f32 %v699_v63, %v622_v1  ;;  %v851_v7 = vpop.f32.mrf.mxu1  ;;  %v2825_v63 = vsub.f32 %v1869_v60, %v1901_v61 }
  0xe9   : > { %v777_v8 = vpop.f32.mrf.mxu0 }
  0xea   : > { %v778_v9 = vadd.f32 %v777_v8, %v700_v6  ;;  %v853_v10 = vpop.f32.mrf.mxu1  ;;  %v1981_v4 = vand.u32 4294901760, %v2825_v63  ;;  %v1986_v6 = vsub.f32 %v1867_v62, %v1903_v0 }
  0xeb   : > { %v779_v11 = vpop.f32.mrf.mxu0 }
  0xec   : > { %v852_v12 = vadd.f32 %v851_v7, %v778_v9  ;;  %v1037_v13 = vpop.f32.mrf.mxu1  ;;  %v1982_v10 = vsub.f32 %v2825_v63, %v1981_v4  ;;  %v1987_v11 = vand.u32 4294901760, %v1986_v6 }
  0xed   : > { %v955_v14 = vpop.f32.mrf.mxu0 }
  0xee   : > { %v1039_v15 = vpop.f32.mrf.mxu1  ;;  %v1350_v16 = vsel %vm1349_vm0, %v852_v12, -inf  ;;  %v1038_v18 = vadd.f32 %v1037_v13, %v955_v14  ;;  %v1983_v14 = vand.u32 4294901760, %v1982_v10 }
  0xef   : > { %v957_v17 = vpop.f32.mrf.mxu0  ;;  %1351 = vmax.xlane.f32.xlu0 %v1350_v16  ;;  %v1988_v15 = vsub.f32 %v1986_v6, %v1987_v11 }
  0xf0   : > { %v1193_v19 = vpop.f32.mrf.mxu1 }
  0xf1   : > { %v1115_v20 = vpop.f32.mrf.mxu0 }
  0xf2   : > { %v1116_v21 = vadd.f32 %v1115_v20, %v1038_v18  ;;  %v1195_v22 = vpop.f32.mrf.mxu1 }
  0xf3   : > { %v1117_v23 = vpop.f32.mrf.mxu0 }
  0xf4   : > { %v1194_v24 = vadd.f32 %v1193_v19, %v1116_v21  ;;  %v1345_v25 = vpop.f32.mrf.mxu1  ;;  %v1989_v19 = vand.u32 4294901760, %v1988_v15 }
  0xf5   : > { %v1271_v26 = vpop.f32.mrf.mxu0 }
  0xf6   : > { %v1272_v27 = vadd.f32 %v1271_v26, %v1194_v24  ;;  %v1347_v28 = vpop.f32.mrf.mxu1 }
  0xf7   : > { %v1273_v29 = vpop.f32.mrf.mxu0 }
  0xf8   : > { %v1346_v30 = vadd.f32 %v1345_v25, %v1272_v27  ;;  %v2710_v27 = vmov 0  }
  0xf9   : > { %2687 = vset.pattern.permute.xlu1 %v2710_v27  ;;  %2686 = vset.pattern.permute.xlu0 %v2710_v27 }
  0xfa   : > { %v1353_v31 = vsel %vm1349_vm0, %v1346_v30, -inf }
  0xfb   : > { %1354 = vmax.xlane.f32.xlu0 %v1353_v31 }
 0x178   : > { %v1352_v32 = vpop.xlane.xlu0 %1351 }
 0x179   : > { %v1356_v33 = vsub.f32 %v852_v12, %v1352_v32 }
 0x17b   : > { %v1358_v34 = vmul.f32 1.442695, %v1356_v33 }
 0x17d   : > { %2688 = vpow2.f32 %v1358_v34 }
 0x184   : > { %v1355_v35 = vpop.xlane.xlu0 %1354 }
 0x185   : > { %v1357_v36 = vsub.f32 %v1346_v30, %v1355_v35 }
 0x187   : > { %v1360_v37 = vmul.f32 1.442695, %v1357_v36 }
 0x189   : > { %2690 = vpow2.f32 %v1360_v37 }
 0x18a   : > { %v2689_v38 = vpop.eup %2688 }
 0x18b   : > { %v1362_v39 = vsel %vm1349_vm0, %v2689_v38, 0.0 }
 0x18c   : > { %1363 = vadd.xlane.f32.xlu1 %v1362_v39 }
 0x196   : > { %v2807_v40 = vpop.eup %2690 }
 0x197   : > { %v1365_v41 = vsel %vm1349_vm0, %v2807_v40, 0.0 }
 0x198   : > { %1366 = vadd.xlane.f32.xlu1 %v1365_v41 }
 0x215   : > { %v1364_v59 = vpop.xlane.xlu1 %1363 }
 0x216   : > { %2692 = vrcp.f32 %v1364_v59  ;;  %v2336_v59 = vld [vmem:[%s329_s15] sm:$0xf] }
 0x221   : > { %v1367_v1 = vpop.xlane.xlu1 %1366 }
 0x222   : > { %2694 = vrcp.f32 %v1367_v1 }
 0x223   : > { %v2693_v2 = vpop.eup %2692 }
 0x224   : > { %v1369_v7 = vmul.f32 %v2693_v2, %v2689_v38 }
 0x226   : > { %v1383_v8 = vsel %vm1381_vm2, %v1369_v7, 0 }
 0x227   : > { %v1457_v9 = vand.u32 4294901760, %v1383_v8 }
 0x229   : > { %v1458_v12 = vsub.f32 %v1383_v8, %v1457_v9  ;;  %1544 = vmatmul.mubr.f32.vlgmr.msra.gmra.mxu1 %v1457_v9 }
 0x22a   : > { %1660 = vmatpush1.msra.mxu1 %v1422_v47  ;;  %1693 = vmatprep.mubr.f32.mxu1 %v2709_v53 }
 0x22b   : > { %v1459_v13 = vand.u32 4294901760, %v1458_v12  ;;  %1812 = vmatprep.subr.mxu1 %v1420_v45 }
 0x22d   : > { %1697 = vmatmul.mubr.f32.vlgmr.msra.gmra.mxu1 %v1459_v13  ;;  %v1460_v16 = vsub.f32 %v1458_v12, %v1459_v13 }
 0x22e   : > { %1814 = vmatpush1.msra.mxu1 %v1422_v47  ;;  %1847 = vmatprep.mubr.f32.mxu1 %v2709_v53 }
 0x22f   : > { %v2695_v17 = vpop.eup %2694  ;;  %v1461_v18 = vand.u32 4294901760, %v1460_v16  ;;  %1984 = vmatprep.subr.mxu1 %v1983_v14 }
 0x230   : > { %v1371_v20 = vmul.f32 %v2695_v17, %v2807_v40 }
 0x231   : > { %1462 = vmatmul.mubr.f32.vlgmr.msra.gmra.mxu0 %v1461_v18  ;;  %1849 = vmatmul.mubr.f32.vlgmr.msra.gmra.mxu1 %v1457_v9 }
 0x232   : > { %1585 = vmatpush1.msra.mxu0 %v2817_v49  ;;  %1618 = vmatprep.mubr.f32.mxu0 %v2709_v53  ;;  %v1865_v21 = vsel %vm1381_vm2, %v1371_v20, 0  ;;  %v2337_v20 = vld [vmem:[%s329_s15 + $0x4] sm:$0xf] }
 0x233   : > { %1736 = vmatprep.subr.mxu0 %v1500_v50  ;;  %1990 = vmatpush1.msra.mxu1 %v1989_v19  ;;  %v1938_v22 = vand.u32 4294901760, %v1865_v21 }
 0x234   : > { %2023 = vmatprep.mubr.f32.mxu1 %v2709_v53  ;;  %2139 = vmatprep.subr.mxu1 %v1901_v61 }
 0x235   : > { %1621 = vmatmul.mubr.f32.vlgmr.msra.gmra.mxu0 %v1458_v12  ;;  %v1939_v23 = vsub.f32 %v1865_v21, %v1938_v22  ;;  %2025 = vmatmul.mubr.f32.vlgmr.msra.gmra.mxu1 %v1938_v22 }
 0x236   : > { %1740 = vmatpush1.msra.mxu0 %v1506_v51  ;;  %1773 = vmatprep.mubr.f32.mxu0 %v2709_v53 }
 0x237   : > { %1902 = vmatprep.subr.mxu0 %v1901_v61  ;;  %2141 = vmatpush1.msra.mxu1 %v1903_v0  ;;  %v1940_v24 = vand.u32 4294901760, %v1939_v23 }
 0x238   : > { %2174 = vmatprep.mubr.f32.mxu1 %v2709_v53  ;;  %2293 = vmatprep.subr.mxu1 %v1901_v61 }
 0x239   : > { %1775 = vmatmul.mubr.f32.vlgmr.msra.gmra.mxu0 %v1457_v9  ;;  %2178 = vmatmul.mubr.f32.vlgmr.msra.gmra.mxu1 %v1940_v24  ;;  %v1941_v25 = vsub.f32 %v1939_v23, %v1940_v24 }
 0x23a   : > { %1904 = vmatpush1.msra.mxu0 %v1903_v0  ;;  %1937 = vmatprep.mubr.f32.mxu0 %v2709_v53 }
 0x23b   : > { %2063 = vmatprep.subr.mxu0 %v2825_v63  ;;  %2295 = vmatpush1.msra.mxu1 %v1903_v0  ;;  %v1942_v26 = vand.u32 4294901760, %v1941_v25 }
 0x23c   : > { %2328 = vmatprep.mubr.f32.mxu1 %v2709_v53 }
 0x23d   : > { %1943 = vmatmul.mubr.f32.vlgmr.msra.gmra.mxu0 %v1942_v26  ;;  %2330 = vmatmul.mubr.f32.vlgmr.msra.gmra.mxu1 %v1938_v22 }
 0x23e   : > { %2066 = vmatpush1.msra.mxu0 %v1986_v6  ;;  %2099 = vmatprep.mubr.f32.mxu0 %v2709_v53 }
 0x23f   : > { %2217 = vmatprep.subr.mxu0 %v1981_v4 }
 0x241   : > { %2102 = vmatmul.mubr.f32.vlgmr.msra.gmra.mxu0 %v1939_v23 }
 0x242   : > { %2221 = vmatpush1.msra.mxu0 %v1987_v11  ;;  %2254 = vmatprep.mubr.f32.mxu0 %v2709_v53 }
 0x245   : > { %2256 = vmatmul.mubr.f32.vlgmr.msra.gmra.mxu0 %v1938_v22 }
 0x2e9   : > { %v1545_v28 = vpop.f32.mrf.mxu1 }
 0x2eb   : > { %v1547_v29 = vpop.f32.mrf.mxu1 }
 0x2ed   : > { %v1698_v30 = vpop.f32.mrf.mxu1 }
 0x2ef   : > { %v1700_v31 = vpop.f32.mrf.mxu1 }
 0x2f1   : > { %v1463_v32 = vpop.f32.mrf.mxu0  ;;  %v1850_v33 = vpop.f32.mrf.mxu1 }
 0x2f2   : > { %v1546_v36 = vadd.f32 %v1545_v28, %v1463_v32  ;;  %v2478_v28 = vld [vmem:[%s2890_s4 + $0x2] sm:$0x3] }
 0x2f3   : > { %v1465_v34 = vpop.f32.mrf.mxu0  ;;  %v1852_v35 = vpop.f32.mrf.mxu1 }
 0x2f4   : > { %v1548_v39 = vadd.f32 %v1547_v29, %v1465_v34  ;;  %v2505_v29 = vld [vmem:[%s2891_s5] sm:$0x3] }
 0x2f5   : > { %v1622_v37 = vpop.f32.mrf.mxu0  ;;  %v2026_v38 = vpop.f32.mrf.mxu1 }
 0x2f6   : > { %v1623_v40 = vadd.f32 %v1622_v37, %v1546_v36 }
 0x2f7   : > { %v1624_v41 = vpop.f32.mrf.mxu0  ;;  %v2028_v44 = vpop.f32.mrf.mxu1 }
 0x2f8   : > { %v1625_v42 = vadd.f32 %v1624_v41, %v1548_v39  ;;  %v1699_v43 = vadd.f32 %v1698_v30, %v1623_v40  ;;  %v2506_v30 = vld [vmem:[%s2891_s5 + $0x2] sm:$0x3] }
 0x2f9   : > { %v1776_v45 = vpop.f32.mrf.mxu0  ;;  %v2179_v50 = vpop.f32.mrf.mxu1 }
 0x2fa   : > { %v1777_v46 = vadd.f32 %v1776_v45, %v1699_v43  ;;  %v1701_v47 = vadd.f32 %v1700_v31, %v1625_v42  ;;  %v2711_v31 = vmov 269488144  }
 0x2fb   : > { %v1778_v48 = vpop.f32.mrf.mxu0  ;;  %v2181_v57 = vpop.f32.mrf.mxu1  ;;  %v2400_v32 = vunpack.c.l.s4 %v2711_v31 }
 0x2fc   : > { %v1779_v49 = vadd.f32 %v1778_v48, %v1701_v47  ;;  %v1851_v52 = vadd.f32 %v1850_v33, %v1777_v46 }
 0x2fd   : > { %v1944_v51 = vpop.f32.mrf.mxu0  ;;  %v2331_v4 = vpop.f32.mrf.mxu1  ;;  %v2401_v33 = vunpack.c.0.s8 %v2400_v32 }
 0x2fe   : > { %v1853_v53 = vadd.f32 %v1852_v35, %v1779_v49  ;;  %v2027_v56 = vadd.f32 %v2026_v38, %v1944_v51 }
 0x2ff   : > { %v1946_v54 = vpop.f32.mrf.mxu0  ;;  %v2333_v13 = vpop.f32.mrf.mxu1  ;;  %v2404_v34 = vsub.s32 %v2401_v33, %v2762_v3 }
 0x300   : > { %v2342_v55 = vcombine.low %v1851_v52, %v1853_v53  ;;  %v2029_v61 = vadd.f32 %v2028_v44, %v1946_v54  ;;  %v2477_v54 = vld [vmem:[%s2890_s4] sm:$0x3] }
 0x301   : > { %v2103_v58 = vpop.f32.mrf.mxu0 }
 0x302   : > { %v2349_v60 = vrot.slane %v2342_v55, %v2776_v5  ;;  %v2104_v62 = vadd.f32 %v2103_v58, %v2027_v56  ;;  %v2666_v55 = vld [vmem:[%s347_s29] ss:$0 sm:$0xff] }
 0x303   : > { %v2105_v63 = vpop.f32.mrf.mxu0 }
 0x304   : > { %v2106_v0 = vadd.f32 %v2105_v63, %v2029_v61  ;;  %v2180_v1 = vadd.f32 %v2179_v50, %v2104_v62  ;;  %v2360_v2 = vadd.f32 %v2349_v60, %v2336_v59 }
 0x305   : > { %v2257_v6 = vpop.f32.mrf.mxu0 }
 0x306   : > { %v2258_v7 = vadd.f32 %v2257_v6, %v2180_v1  ;;  %v2182_v8 = vadd.f32 %v2181_v57, %v2106_v0  ;;  %v2370_v9 = vrot.slane %v2360_v2, %v2776_v5 }
 0x307   : > { %v2259_v10 = vpop.f32.mrf.mxu0 }
 0x308   : > { %v2260_v11 = vadd.f32 %v2259_v10, %v2182_v8  ;;  %v2371_v12 = vcombine.high %v2370_v9, %v2370_v9  ;;  %v2332_v14 = vadd.f32 %v2331_v4, %v2258_v7  ;;  %v2384_v16 = vsel %vm1385_vm1, %v2370_v9, 0.0 }
 0x30a   : > { %v2334_v15 = vadd.f32 %v2333_v13, %v2260_v11  ;;  %v2385_v17 = vsel %vm1385_vm1, %v2371_v12, 0.0 }
 0x30b   : > { %v2386_v18 = vadd.f32 %v2385_v17, %v2384_v16 }
 0x30c   : > { %v2350_v19 = vcombine.low %v2332_v14, %v2334_v15 }
 0x30d   : > { %2387 = vadd.xlane.f32.xlu0 %v2386_v18 }
 0x30e   : > { %v2357_v21 = vrot.slane %v2350_v19, %v2776_v5 }
 0x310   : > { %v2361_v22 = vadd.f32 %v2357_v21, %v2337_v20 }
 0x312   : > { %v2378_v23 = vrot.slane %v2361_v22, %v2776_v5 }
 0x314   : > { %v2379_v24 = vcombine.high %v2378_v23, %v2378_v23  ;;  %v2389_v25 = vsel %vm1385_vm1, %v2378_v23, 0.0 }
 0x316   : > { %v2390_v26 = vsel %vm1385_vm1, %v2379_v24, 0.0 }
 0x317   : > { %v2391_v27 = vadd.f32 %v2390_v26, %v2389_v25 }
 0x319   : > { %2392 = vadd.xlane.f32.xlu1 %v2391_v27 }
 0x32a   : > { %2485 = vperm.xlu1 %2687, %v2478_v28  }
 0x32e   : > { %2509 = vperm.xlu1 %2687, %v2505_v29  }
 0x332   : > { %2513 = vperm.xlu1 %2687, %v2506_v30  }
 0x396   : > { %v2388_v35 = vpop.xlane.xlu0 %2387 }
 0x397   : > { %v2395_v36 = vmul.f32 0.00390625, %v2388_v35 }
 0x399   : > { %v2405_v37 = vrot.slane %v2395_v36, %v2404_v34 }
 0x39b   : > { %v2415_v38 = vsub.f32 %v2360_v2, %v2405_v37 }
 0x39d   : > { %v2417_v39 = vmul.f32 %v2415_v38, %v2415_v38 }
 0x39f   : > { %v2427_v40 = vrot.slane %v2417_v39, %v2776_v5 }
 0x3a1   : > { %v2428_v41 = vcombine.high %v2427_v40, %v2427_v40  ;;  %v2441_v44 = vsel %vm1385_vm1, %v2427_v40, 0.0 }
 0x3a2   : > { %v2393_v42 = vpop.xlane.xlu1 %2392 }
 0x3a3   : > { %v2396_v43 = vmul.f32 0.00390625, %v2393_v42  ;;  %v2442_v45 = vsel %vm1385_vm1, %v2428_v41, 0.0 }
 0x3a4   : > { %v2443_v46 = vadd.f32 %v2442_v45, %v2441_v44 }
 0x3a5   : > { %v2412_v47 = vrot.slane %v2396_v43, %v2404_v34 }
 0x3a6   : > { %2444 = vadd.xlane.f32.xlu0 %v2443_v46  ;;  %v2486_v56 = vpop.permute.xlu1 %2485 }
 0x3a7   : > { %v2416_v48 = vsub.f32 %v2361_v22, %v2412_v47  ;;  %v2500_v14 = vrot.slane %v2486_v56, %v2404_v34 }
 0x3a9   : > { %v2418_v3 = vmul.f32 %v2416_v48, %v2416_v48 }
 0x3aa   : > { %v2510_v58 = vpop.permute.xlu1 %2509 }
 0x3ab   : > { %v2435_v49 = vrot.slane %v2418_v3, %v2776_v5  ;;  %v2521_v7 = vrot.slane %v2510_v58, %v2404_v34 }
 0x3ad   : > { %v2436_v50 = vcombine.high %v2435_v49, %v2435_v49  ;;  %v2446_v51 = vsel %vm1385_vm1, %v2435_v49, 0.0 }
 0x3ae   : > { %v2514_v60 = vpop.permute.xlu1 %2513 }
 0x3af   : > { %v2447_v52 = vsel %vm1385_vm1, %v2436_v50, 0.0  ;;  %v2528_v16 = vrot.slane %v2514_v60, %v2404_v34 }
 0x3b0   : > { %v2448_v53 = vadd.f32 %v2447_v52, %v2446_v51 }
 0x3b2   : > { %2449 = vadd.xlane.f32.xlu1 %v2448_v53 }
 0x3bc   : > { %2481 = vperm.xlu0 %2686, %v2477_v54  }
 0x3c3   : > { %2540 = vperm.xlu1 %2687, %v2666_v55  }
 0x42f   : > { %v2445_v5 = vpop.xlane.xlu0 %2444 }
 0x430   : > { %v2451_v57 = vmul.f32 0.00390625, %v2445_v5 }
 0x432   : > { %v2453_v59 = vadd.f32 1e-05, %v2451_v57 }
 0x434   : > { %2696 = vrsqrt.f32 %v2453_v59 }
 0x437   : > { %v2482_v0 = vpop.permute.xlu0 %2481 }
 0x438   : > { %v2493_v4 = vrot.slane %v2482_v0, %v2404_v34 }
 0x43b   : > { %v2450_v61 = vpop.xlane.xlu1 %2449 }
 0x43c   : > { %v2452_v62 = vmul.f32 0.00390625, %v2450_v61 }
 0x43e   : > { %v2454_v63 = vadd.f32 1e-05, %v2452_v62 }
 0x43f   : > { %v2541_v10 = vpop.permute.xlu1 %2540 }
 0x440   : > { %2698 = vrsqrt.f32 %v2454_v63 }
 0x441   : > { %v2697_v1 = vpop.eup %2696 }
 0x442   : > { %v2465_v2 = vrot.slane %v2697_v1, %v2404_v34 }
 0x444   : > { %v2475_v6 = vmul.f32 %v2465_v2, %v2415_v38 }
 0x446   : > { %v2503_v8 = vmul.f32 %v2493_v4, %v2475_v6 }
 0x448   : > { %v2531_v9 = vadd.f32 %v2521_v7, %v2503_v8 }
 0x44a   : > { %v2543_v11 = vmul.f32 %v2541_v10, %v2531_v9 }
 0x44c   : > { %2545 = vst [vmem:[%s352_s8] sm:$0xf] %v2543_v11 }
 0x44d   : > { %v2699_v12 = vpop.eup %2698 }
 0x44e   : > { %v2472_v13 = vrot.slane %v2699_v12, %v2404_v34 }
 0x450   : > { %v2476_v15 = vmul.f32 %v2472_v13, %v2416_v48 }
 0x452   : > { %v2504_v17 = vmul.f32 %v2500_v14, %v2476_v15 }
 0x454   : > { %v2532_v18 = vadd.f32 %v2528_v16, %v2504_v17 }
 0x456   : > { %v2544_v19 = vmul.f32 %v2541_v10, %v2532_v18 }
 0x458   : > { %2546 = vst [vmem:[%s352_s8 + $0x4] sm:$0xf] %v2544_v19 }
 0x459 PF: > { %s17_s24 = sadd.s32 1, %s2706_s24  }
 0x45a   : > { %p14_p4 = scmp.ge.s32.totalorder %s17_s24, 4  }
 0x45c   :  { %16 = sbr.rel (!%p14_p4) target bundleno = 1 (0x1), region = 90 }

</bundles_post_ra>
